<compile_context>
chip_gen: v7x
topology: tpu7x:2x2x1
jax: 0.10.0
libtpu: 0.0.40
codegen_flags: <defaults>
</compile_context>

<pallas_src>
import jax
import jax.numpy as jnp
from jax.experimental import pallas as pl
from jax.experimental.pallas import tpu as pltpu

_LANE = 128      # lane width: batch tile must be a multiple of this
_MAX_BB = 512    # cap on the batch tile per grid step (keeps vreg/VMEM modest)


def _round_up(x, m):
    return ((x + m - 1) // m) * m


def _make_kernel(c_dim, l_out, t_dim, bb):
    """Kernel processing a batch tile of `bb` elements (on the lane axis)."""

    def kernel(x_ref, wc_ref, bc_ref, wl_ref, bl_ref, o_ref, y_buf):
        # Resident fused weight / bias (constant index maps -> loaded once).
        wc = wc_ref[...]                                      # (L_out, 2*L_in)
        # Hoisted lane-broadcast of the fused bias (done once per grid step).
        bcb = jnp.broadcast_to(bc_ref[...], (l_out, bb))      # (L_out, bb)

        # Stage 1: fused (2*trend + 0.5*seasonal) projection + clip, per channel.
        # x_ref[c] is (2*L_in, bb): K on sublanes, batch on lanes (dense).
        for c in range(c_dim):
            y = jnp.dot(wc, x_ref[c], preferred_element_type=jnp.float32)
            y_buf[c] = jnp.clip(y + bcb, 0.0, 4.0)            # (L_out, bb)

        # Stage 2: last_linear (C=11 -> T) as scalar-weighted VPU FMAs with the
        # tiny weights read from SMEM; batch stays on lanes so every store is a
        # full-lane unmasked vst.
        for t in range(t_dim):
            acc = jnp.full((l_out, bb), bl_ref[t], dtype=jnp.float32)
            for c in range(c_dim):
                acc = acc + wl_ref[t, c] * y_buf[c]
            o_ref[t] = acc.astype(o_ref.dtype)

    return kernel


def ltsf_nlinear_forward(x_mean, x_res, torch_params):
    """LTSF_NLinear forward.

    torch-layout params: W (out_features, in_features), b (out_features,).
    x_mean/x_res: (B, input_size, 11).  Returns (B, output_size, target_size).
    """
    w_t, b_t, w_s, b_s, w_l, b_l = torch_params
    B, L_in, C = x_mean.shape
    L_out = w_t.shape[0]
    T = w_l.shape[0]

    # --- host-side weight fusion (free; pure layout/scale plumbing) ---
    w_comb = jnp.concatenate([2.0 * w_t, 0.5 * w_s], axis=1)    # (L_out, 2*L_in)
    b_comb = (2.0 * b_t + 0.5 * b_s).reshape(L_out, 1)          # (L_out, 1)

    # --- lane-dense batch layout + padding ---
    bb = min(_round_up(B, _LANE), _MAX_BB)
    B_pad = _round_up(B, bb)
    grid = (B_pad // bb,)

    x_comb = jnp.concatenate([x_mean, x_res], axis=1)           # (B, 2*L_in, C)
    x_t = jnp.transpose(x_comb, (2, 1, 0))                      # (C, 2*L_in, B)
    if B_pad != B:
        x_t = jnp.pad(x_t, ((0, 0), (0, 0), (0, B_pad - B)))

    kernel = _make_kernel(C, L_out, T, bb)

    out_t = pl.pallas_call(
        kernel,
        out_shape=jax.ShapeDtypeStruct((T, L_out, B_pad), x_mean.dtype),
        grid=grid,
        in_specs=[
            pl.BlockSpec((C, 2 * L_in, bb), lambda i: (0, 0, i)),   # x batch tile
            pl.BlockSpec((L_out, 2 * L_in), lambda i: (0, 0)),      # W_comb (resident)
            pl.BlockSpec((L_out, 1), lambda i: (0, 0)),             # b_comb (resident)
            pl.BlockSpec(memory_space=pltpu.MemorySpace.SMEM),      # W_last (T, C) scalars
            pl.BlockSpec(memory_space=pltpu.MemorySpace.SMEM),      # b_last (T,) scalars
        ],
        out_specs=pl.BlockSpec((T, L_out, bb), lambda i: (0, 0, i)),
        scratch_shapes=[pltpu.VMEM((C, L_out, bb), jnp.float32)],
        compiler_params=pltpu.CompilerParams(
            dimension_semantics=("parallel",)),
    )(x_t, w_comb, b_comb, w_l, b_l)

    # (T, L_out, B_pad) -> (B, L_out, T); drop the batch padding.
    return jnp.transpose(out_t[:, :, :B], (2, 1, 0))


def init_linear(key, in_features, out_features):
    """torch.nn.Linear default init: U(-1/sqrt(in), 1/sqrt(in)).
    Returns W as (out_features, in_features) and b as (out_features,)."""
    kw, kb = jax.random.split(key)
    bound = 1.0 / (in_features ** 0.5)
    w = jax.random.uniform(kw, (out_features, in_features),
                           minval=-bound, maxval=bound, dtype=jnp.float32)
    b = jax.random.uniform(kb, (out_features,),
                           minval=-bound, maxval=bound, dtype=jnp.float32)
    return w, b


def reference_forward(x_mean, x_res, torch_params):
    """Pure-JAX reference with identical semantics to the PyTorch module."""
    w_t, b_t, w_s, b_s, w_l, b_l = torch_params
    trend_init = jnp.transpose(x_mean, (0, 2, 1))        # (B, C, L_in)
    seasonal_init = jnp.transpose(x_res, (0, 2, 1))
    trend = trend_init @ w_t.T + b_t                     # (B, C, L_out)
    seasonal = seasonal_init @ w_s.T + b_s
    x = seasonal / 2.0 + trend * 2.0
    x = jnp.clip(x, 0.0, 4.0)
    x = jnp.transpose(x, (0, 2, 1))                      # (B, L_out, C)
    return x @ w_l.T + b_l                               # (B, L_out, T)


if __name__ == "__main__":
    # Small, module-consistent sizes.
    B = 2
    input_size = 8        # seq_len of the input window
    output_size = 16      # forecast horizon
    target_size = 4
    C = 11                # channels; fixed by last_linear = Linear(11, target_size)

    key = jax.random.PRNGKey(0)
    k_xm, k_xr, k_t, k_s, k_l = jax.random.split(key, 5)

    x_mean = jax.random.normal(k_xm, (B, input_size, C), dtype=jnp.float32)
    x_res = jax.random.normal(k_xr, (B, input_size, C), dtype=jnp.float32)

    w_t, b_t = init_linear(k_t, input_size, output_size)
    w_s, b_s = init_linear(k_s, input_size, output_size)
    w_l, b_l = init_linear(k_l, C, target_size)
    torch_params = (w_t, b_t, w_s, b_s, w_l, b_l)

    out = jax.block_until_ready(ltsf_nlinear_forward(x_mean, x_res, torch_params))
    ref = reference_forward(x_mean, x_res, torch_params)

    assert out.shape == (B, output_size, target_size)
    assert jnp.allclose(out, ref, atol=1e-5, rtol=1e-5)

    print("KERNEL_OK")
</pallas_src>

<mosaic_0001>
module attributes {stable_mosaic.version = 11 : i64} {
  func.func @kernel(%arg0: i32, %arg1: memref<11x16x128xf32, #tpu.memory_space<vmem>>, %arg2: memref<16x16xf32, #tpu.memory_space<vmem>>, %arg3: memref<16x1xf32, #tpu.memory_space<vmem>>, %arg4: memref<4x11xf32, #tpu.memory_space<smem>>, %arg5: memref<4xf32, #tpu.memory_space<smem>>, %arg6: memref<4x16x128xf32, #tpu.memory_space<vmem>>, %arg7: memref<11x16x128xf32, #tpu.memory_space<vmem>>) attributes {dimension_semantics = [#tpu.dimension_semantics<parallel>], iteration_bounds = array<i64: 1>, scalar_prefetch = 0 : i64, scratch_operands = 1 : i64, tpu.core_type = #tpu.core_type<tc>, window_params = [{transform_indices = @transform_0, window_bounds = array<i64: 11, 16, 128>}, {pipeline_mode = #tpu.pipeline_mode<synchronous>, transform_indices = @transform_1, window_bounds = array<i64: 16, 16>}, {pipeline_mode = #tpu.pipeline_mode<synchronous>, transform_indices = @transform_2, window_bounds = array<i64: 16, 1>}, {transform_indices = @transform_3, window_bounds = array<i64: 4, 11>}, {transform_indices = @transform_4, window_bounds = array<i64: 4>}, {transform_indices = @transform_5, window_bounds = array<i64: 4, 16, 128>}]} {
    %c0 = arith.constant 0 : index
    %c0_0 = arith.constant 0 : index
    %0 = vector.load %arg2[%c0, %c0_0] : memref<16x16xf32, #tpu.memory_space<vmem>>, vector<16x16xf32>
    %c0_1 = arith.constant 0 : index
    %c0_2 = arith.constant 0 : index
    %1 = vector.load %arg3[%c0_1, %c0_2] : memref<16x1xf32, #tpu.memory_space<vmem>>, vector<16x1xf32>
    %2 = vector.shape_cast %1 : vector<16x1xf32> to vector<16x1xf32>
    %3 = vector.broadcast %2 : vector<16x1xf32> to vector<16x128xf32>
    %c0_3 = arith.constant 0 : index
    %c0_4 = arith.constant 0 : index
    %c0_5 = arith.constant 0 : index
    %4 = vector.load %arg1[%c0_3, %c0_4, %c0_5] : memref<11x16x128xf32, #tpu.memory_space<vmem>>, vector<1x16x128xf32>
    %5 = vector.shape_cast %4 : vector<1x16x128xf32> to vector<16x128xf32>
    %cst = arith.constant dense<0.000000e+00> : vector<16x128xf32>
    %6 = tpu.matmul %0, %5, %cst {dimension_numbers = #tpu.dot_dimension_numbers<[1], [0], [0], [1], [0, 0, 1, 1], [], []>} : vector<16x16xf32>, vector<16x128xf32>, vector<16x128xf32> -> vector<16x128xf32>
    %7 = arith.addf %6, %3 : vector<16x128xf32>
    %cst_6 = arith.constant 0.000000e+00 : f32
    %cst_7 = arith.constant 4.000000e+00 : f32
    %8 = vector.broadcast %cst_6 : f32 to vector<16x128xf32>
    %9 = arith.maximumf %8, %7 : vector<16x128xf32>
    %10 = vector.broadcast %cst_7 : f32 to vector<16x128xf32>
    %11 = arith.minimumf %10, %9 : vector<16x128xf32>
    %c0_8 = arith.constant 0 : index
    %c0_9 = arith.constant 0 : index
    %c0_10 = arith.constant 0 : index
    %12 = vector.load %arg7[%c0_8, %c0_9, %c0_10] : memref<11x16x128xf32, #tpu.memory_space<vmem>>, vector<1x16x128xf32>
    %13 = vector.shape_cast %12 : vector<1x16x128xf32> to vector<16x128xf32>
    %14 = vector.shape_cast %11 : vector<16x128xf32> to vector<1x16x128xf32>
    tpu.vector_store %arg7[%c0_8, %c0_9, %c0_10], %14 {strides = array<i32>} : memref<11x16x128xf32, #tpu.memory_space<vmem>>, vector<1x16x128xf32>,
    %c1 = arith.constant 1 : index
    %c0_11 = arith.constant 0 : index
    %c0_12 = arith.constant 0 : index
    %15 = vector.load %arg1[%c1, %c0_11, %c0_12] : memref<11x16x128xf32, #tpu.memory_space<vmem>>, vector<1x16x128xf32>
    %16 = vector.shape_cast %15 : vector<1x16x128xf32> to vector<16x128xf32>
    %cst_13 = arith.constant dense<0.000000e+00> : vector<16x128xf32>
    %17 = tpu.matmul %0, %16, %cst_13 {dimension_numbers = #tpu.dot_dimension_numbers<[1], [0], [0], [1], [0, 0, 1, 1], [], []>} : vector<16x16xf32>, vector<16x128xf32>, vector<16x128xf32> -> vector<16x128xf32>
    %18 = arith.addf %17, %3 : vector<16x128xf32>
    %cst_14 = arith.constant 0.000000e+00 : f32
    %cst_15 = arith.constant 4.000000e+00 : f32
    %19 = vector.broadcast %cst_14 : f32 to vector<16x128xf32>
    %20 = arith.maximumf %19, %18 : vector<16x128xf32>
    %21 = vector.broadcast %cst_15 : f32 to vector<16x128xf32>
    %22 = arith.minimumf %21, %20 : vector<16x128xf32>
    %c1_16 = arith.constant 1 : index
    %c0_17 = arith.constant 0 : index
    %c0_18 = arith.constant 0 : index
    %23 = vector.load %arg7[%c1_16, %c0_17, %c0_18] : memref<11x16x128xf32, #tpu.memory_space<vmem>>, vector<1x16x128xf32>
    %24 = vector.shape_cast %23 : vector<1x16x128xf32> to vector<16x128xf32>
    %25 = vector.shape_cast %22 : vector<16x128xf32> to vector<1x16x128xf32>
    tpu.vector_store %arg7[%c1_16, %c0_17, %c0_18], %25 {strides = array<i32>} : memref<11x16x128xf32, #tpu.memory_space<vmem>>, vector<1x16x128xf32>,
    %c2 = arith.constant 2 : index
    %c0_19 = arith.constant 0 : index
    %c0_20 = arith.constant 0 : index
    %26 = vector.load %arg1[%c2, %c0_19, %c0_20] : memref<11x16x128xf32, #tpu.memory_space<vmem>>, vector<1x16x128xf32>
    %27 = vector.shape_cast %26 : vector<1x16x128xf32> to vector<16x128xf32>
    %cst_21 = arith.constant dense<0.000000e+00> : vector<16x128xf32>
    %28 = tpu.matmul %0, %27, %cst_21 {dimension_numbers = #tpu.dot_dimension_numbers<[1], [0], [0], [1], [0, 0, 1, 1], [], []>} : vector<16x16xf32>, vector<16x128xf32>, vector<16x128xf32> -> vector<16x128xf32>
    %29 = arith.addf %28, %3 : vector<16x128xf32>
    %cst_22 = arith.constant 0.000000e+00 : f32
    %cst_23 = arith.constant 4.000000e+00 : f32
    %30 = vector.broadcast %cst_22 : f32 to vector<16x128xf32>
    %31 = arith.maximumf %30, %29 : vector<16x128xf32>
    %32 = vector.broadcast %cst_23 : f32 to vector<16x128xf32>
    %33 = arith.minimumf %32, %31 : vector<16x128xf32>
    %c2_24 = arith.constant 2 : index
    %c0_25 = arith.constant 0 : index
    %c0_26 = arith.constant 0 : index
    %34 = vector.load %arg7[%c2_24, %c0_25, %c0_26] : memref<11x16x128xf32, #tpu.memory_space<vmem>>, vector<1x16x128xf32>
    %35 = vector.shape_cast %34 : vector<1x16x128xf32> to vector<16x128xf32>
    %36 = vector.shape_cast %33 : vector<16x128xf32> to vector<1x16x128xf32>
    tpu.vector_store %arg7[%c2_24, %c0_25, %c0_26], %36 {strides = array<i32>} : memref<11x16x128xf32, #tpu.memory_space<vmem>>, vector<1x16x128xf32>,
    %c3 = arith.constant 3 : index
    %c0_27 = arith.constant 0 : index
    %c0_28 = arith.constant 0 : index
    %37 = vector.load %arg1[%c3, %c0_27, %c0_28] : memref<11x16x128xf32, #tpu.memory_space<vmem>>, vector<1x16x128xf32>
    %38 = vector.shape_cast %37 : vector<1x16x128xf32> to vector<16x128xf32>
    %cst_29 = arith.constant dense<0.000000e+00> : vector<16x128xf32>
    %39 = tpu.matmul %0, %38, %cst_29 {dimension_numbers = #tpu.dot_dimension_numbers<[1], [0], [0], [1], [0, 0, 1, 1], [], []>} : vector<16x16xf32>, vector<16x128xf32>, vector<16x128xf32> -> vector<16x128xf32>
    %40 = arith.addf %39, %3 : vector<16x128xf32>
    %cst_30 = arith.constant 0.000000e+00 : f32
    %cst_31 = arith.constant 4.000000e+00 : f32
    %41 = vector.broadcast %cst_30 : f32 to vector<16x128xf32>
    %42 = arith.maximumf %41, %40 : vector<16x128xf32>
    %43 = vector.broadcast %cst_31 : f32 to vector<16x128xf32>
    %44 = arith.minimumf %43, %42 : vector<16x128xf32>
    %c3_32 = arith.constant 3 : index
    %c0_33 = arith.constant 0 : index
    %c0_34 = arith.constant 0 : index
    %45 = vector.load %arg7[%c3_32, %c0_33, %c0_34] : memref<11x16x128xf32, #tpu.memory_space<vmem>>, vector<1x16x128xf32>
    %46 = vector.shape_cast %45 : vector<1x16x128xf32> to vector<16x128xf32>
    %47 = vector.shape_cast %44 : vector<16x128xf32> to vector<1x16x128xf32>
    tpu.vector_store %arg7[%c3_32, %c0_33, %c0_34], %47 {strides = array<i32>} : memref<11x16x128xf32, #tpu.memory_space<vmem>>, vector<1x16x128xf32>,
    %c4 = arith.constant 4 : index
    %c0_35 = arith.constant 0 : index
    %c0_36 = arith.constant 0 : index
    %48 = vector.load %arg1[%c4, %c0_35, %c0_36] : memref<11x16x128xf32, #tpu.memory_space<vmem>>, vector<1x16x128xf32>
    %49 = vector.shape_cast %48 : vector<1x16x128xf32> to vector<16x128xf32>
    %cst_37 = arith.constant dense<0.000000e+00> : vector<16x128xf32>
    %50 = tpu.matmul %0, %49, %cst_37 {dimension_numbers = #tpu.dot_dimension_numbers<[1], [0], [0], [1], [0, 0, 1, 1], [], []>} : vector<16x16xf32>, vector<16x128xf32>, vector<16x128xf32> -> vector<16x128xf32>
    %51 = arith.addf %50, %3 : vector<16x128xf32>
    %cst_38 = arith.constant 0.000000e+00 : f32
    %cst_39 = arith.constant 4.000000e+00 : f32
    %52 = vector.broadcast %cst_38 : f32 to vector<16x128xf32>
    %53 = arith.maximumf %52, %51 : vector<16x128xf32>
    %54 = vector.broadcast %cst_39 : f32 to vector<16x128xf32>
    %55 = arith.minimumf %54, %53 : vector<16x128xf32>
    %c4_40 = arith.constant 4 : index
    %c0_41 = arith.constant 0 : index
    %c0_42 = arith.constant 0 : index
    %56 = vector.load %arg7[%c4_40, %c0_41, %c0_42] : memref<11x16x128xf32, #tpu.memory_space<vmem>>, vector<1x16x128xf32>
    %57 = vector.shape_cast %56 : vector<1x16x128xf32> to vector<16x128xf32>
    %58 = vector.shape_cast %55 : vector<16x128xf32> to vector<1x16x128xf32>
    tpu.vector_store %arg7[%c4_40, %c0_41, %c0_42], %58 {strides = array<i32>} : memref<11x16x128xf32, #tpu.memory_space<vmem>>, vector<1x16x128xf32>,
    %c5 = arith.constant 5 : index
    %c0_43 = arith.constant 0 : index
    %c0_44 = arith.constant 0 : index
    %59 = vector.load %arg1[%c5, %c0_43, %c0_44] : memref<11x16x128xf32, #tpu.memory_space<vmem>>, vector<1x16x128xf32>
    %60 = vector.shape_cast %59 : vector<1x16x128xf32> to vector<16x128xf32>
    %cst_45 = arith.constant dense<0.000000e+00> : vector<16x128xf32>
    %61 = tpu.matmul %0, %60, %cst_45 {dimension_numbers = #tpu.dot_dimension_numbers<[1], [0], [0], [1], [0, 0, 1, 1], [], []>} : vector<16x16xf32>, vector<16x128xf32>, vector<16x128xf32> -> vector<16x128xf32>
    %62 = arith.addf %61, %3 : vector<16x128xf32>
    %cst_46 = arith.constant 0.000000e+00 : f32
    %cst_47 = arith.constant 4.000000e+00 : f32
    %63 = vector.broadcast %cst_46 : f32 to vector<16x128xf32>
    %64 = arith.maximumf %63, %62 : vector<16x128xf32>
    %65 = vector.broadcast %cst_47 : f32 to vector<16x128xf32>
    %66 = arith.minimumf %65, %64 : vector<16x128xf32>
    %c5_48 = arith.constant 5 : index
    %c0_49 = arith.constant 0 : index
    %c0_50 = arith.constant 0 : index
    %67 = vector.load %arg7[%c5_48, %c0_49, %c0_50] : memref<11x16x128xf32, #tpu.memory_space<vmem>>, vector<1x16x128xf32>
    %68 = vector.shape_cast %67 : vector<1x16x128xf32> to vector<16x128xf32>
    %69 = vector.shape_cast %66 : vector<16x128xf32> to vector<1x16x128xf32>
    tpu.vector_store %arg7[%c5_48, %c0_49, %c0_50], %69 {strides = array<i32>} : memref<11x16x128xf32, #tpu.memory_space<vmem>>, vector<1x16x128xf32>,
    %c6 = arith.constant 6 : index
    %c0_51 = arith.constant 0 : index
    %c0_52 = arith.constant 0 : index
    %70 = vector.load %arg1[%c6, %c0_51, %c0_52] : memref<11x16x128xf32, #tpu.memory_space<vmem>>, vector<1x16x128xf32>
    %71 = vector.shape_cast %70 : vector<1x16x128xf32> to vector<16x128xf32>
    %cst_53 = arith.constant dense<0.000000e+00> : vector<16x128xf32>
    %72 = tpu.matmul %0, %71, %cst_53 {dimension_numbers = #tpu.dot_dimension_numbers<[1], [0], [0], [1], [0, 0, 1, 1], [], []>} : vector<16x16xf32>, vector<16x128xf32>, vector<16x128xf32> -> vector<16x128xf32>
    %73 = arith.addf %72, %3 : vector<16x128xf32>
    %cst_54 = arith.constant 0.000000e+00 : f32
    %cst_55 = arith.constant 4.000000e+00 : f32
    %74 = vector.broadcast %cst_54 : f32 to vector<16x128xf32>
    %75 = arith.maximumf %74, %73 : vector<16x128xf32>
    %76 = vector.broadcast %cst_55 : f32 to vector<16x128xf32>
    %77 = arith.minimumf %76, %75 : vector<16x128xf32>
    %c6_56 = arith.constant 6 : index
    %c0_57 = arith.constant 0 : index
    %c0_58 = arith.constant 0 : index
    %78 = vector.load %arg7[%c6_56, %c0_57, %c0_58] : memref<11x16x128xf32, #tpu.memory_space<vmem>>, vector<1x16x128xf32>
    %79 = vector.shape_cast %78 : vector<1x16x128xf32> to vector<16x128xf32>
    %80 = vector.shape_cast %77 : vector<16x128xf32> to vector<1x16x128xf32>
    tpu.vector_store %arg7[%c6_56, %c0_57, %c0_58], %80 {strides = array<i32>} : memref<11x16x128xf32, #tpu.memory_space<vmem>>, vector<1x16x128xf32>,
    %c7 = arith.constant 7 : index
    %c0_59 = arith.constant 0 : index
    %c0_60 = arith.constant 0 : index
    %81 = vector.load %arg1[%c7, %c0_59, %c0_60] : memref<11x16x128xf32, #tpu.memory_space<vmem>>, vector<1x16x128xf32>
    %82 = vector.shape_cast %81 : vector<1x16x128xf32> to vector<16x128xf32>
    %cst_61 = arith.constant dense<0.000000e+00> : vector<16x128xf32>
    %83 = tpu.matmul %0, %82, %cst_61 {dimension_numbers = #tpu.dot_dimension_numbers<[1], [0], [0], [1], [0, 0, 1, 1], [], []>} : vector<16x16xf32>, vector<16x128xf32>, vector<16x128xf32> -> vector<16x128xf32>
    %84 = arith.addf %83, %3 : vector<16x128xf32>
    %cst_62 = arith.constant 0.000000e+00 : f32
    %cst_63 = arith.constant 4.000000e+00 : f32
    %85 = vector.broadcast %cst_62 : f32 to vector<16x128xf32>
    %86 = arith.maximumf %85, %84 : vector<16x128xf32>
    %87 = vector.broadcast %cst_63 : f32 to vector<16x128xf32>
    %88 = arith.minimumf %87, %86 : vector<16x128xf32>
    %c7_64 = arith.constant 7 : index
    %c0_65 = arith.constant 0 : index
    %c0_66 = arith.constant 0 : index
    %89 = vector.load %arg7[%c7_64, %c0_65, %c0_66] : memref<11x16x128xf32, #tpu.memory_space<vmem>>, vector<1x16x128xf32>
    %90 = vector.shape_cast %89 : vector<1x16x128xf32> to vector<16x128xf32>
    %91 = vector.shape_cast %88 : vector<16x128xf32> to vector<1x16x128xf32>
    tpu.vector_store %arg7[%c7_64, %c0_65, %c0_66], %91 {strides = array<i32>} : memref<11x16x128xf32, #tpu.memory_space<vmem>>, vector<1x16x128xf32>,
    %c8 = arith.constant 8 : index
    %c0_67 = arith.constant 0 : index
    %c0_68 = arith.constant 0 : index
    %92 = vector.load %arg1[%c8, %c0_67, %c0_68] : memref<11x16x128xf32, #tpu.memory_space<vmem>>, vector<1x16x128xf32>
    %93 = vector.shape_cast %92 : vector<1x16x128xf32> to vector<16x128xf32>
    %cst_69 = arith.constant dense<0.000000e+00> : vector<16x128xf32>
    %94 = tpu.matmul %0, %93, %cst_69 {dimension_numbers = #tpu.dot_dimension_numbers<[1], [0], [0], [1], [0, 0, 1, 1], [], []>} : vector<16x16xf32>, vector<16x128xf32>, vector<16x128xf32> -> vector<16x128xf32>
    %95 = arith.addf %94, %3 : vector<16x128xf32>
    %cst_70 = arith.constant 0.000000e+00 : f32
    %cst_71 = arith.constant 4.000000e+00 : f32
    %96 = vector.broadcast %cst_70 : f32 to vector<16x128xf32>
    %97 = arith.maximumf %96, %95 : vector<16x128xf32>
    %98 = vector.broadcast %cst_71 : f32 to vector<16x128xf32>
    %99 = arith.minimumf %98, %97 : vector<16x128xf32>
    %c8_72 = arith.constant 8 : index
    %c0_73 = arith.constant 0 : index
    %c0_74 = arith.constant 0 : index
    %100 = vector.load %arg7[%c8_72, %c0_73, %c0_74] : memref<11x16x128xf32, #tpu.memory_space<vmem>>, vector<1x16x128xf32>
    %101 = vector.shape_cast %100 : vector<1x16x128xf32> to vector<16x128xf32>
    %102 = vector.shape_cast %99 : vector<16x128xf32> to vector<1x16x128xf32>
    tpu.vector_store %arg7[%c8_72, %c0_73, %c0_74], %102 {strides = array<i32>} : memref<11x16x128xf32, #tpu.memory_space<vmem>>, vector<1x16x128xf32>,
    %c9 = arith.constant 9 : index
    %c0_75 = arith.constant 0 : index
    %c0_76 = arith.constant 0 : index
    %103 = vector.load %arg1[%c9, %c0_75, %c0_76] : memref<11x16x128xf32, #tpu.memory_space<vmem>>, vector<1x16x128xf32>
    %104 = vector.shape_cast %103 : vector<1x16x128xf32> to vector<16x128xf32>
    %cst_77 = arith.constant dense<0.000000e+00> : vector<16x128xf32>
    %105 = tpu.matmul %0, %104, %cst_77 {dimension_numbers = #tpu.dot_dimension_numbers<[1], [0], [0], [1], [0, 0, 1, 1], [], []>} : vector<16x16xf32>, vector<16x128xf32>, vector<16x128xf32> -> vector<16x128xf32>
    %106 = arith.addf %105, %3 : vector<16x128xf32>
    %cst_78 = arith.constant 0.000000e+00 : f32
    %cst_79 = arith.constant 4.000000e+00 : f32
    %107 = vector.broadcast %cst_78 : f32 to vector<16x128xf32>
    %108 = arith.maximumf %107, %106 : vector<16x128xf32>
    %109 = vector.broadcast %cst_79 : f32 to vector<16x128xf32>
    %110 = arith.minimumf %109, %108 : vector<16x128xf32>
    %c9_80 = arith.constant 9 : index
    %c0_81 = arith.constant 0 : index
    %c0_82 = arith.constant 0 : index
    %111 = vector.load %arg7[%c9_80, %c0_81, %c0_82] : memref<11x16x128xf32, #tpu.memory_space<vmem>>, vector<1x16x128xf32>
    %112 = vector.shape_cast %111 : vector<1x16x128xf32> to vector<16x128xf32>
    %113 = vector.shape_cast %110 : vector<16x128xf32> to vector<1x16x128xf32>
    tpu.vector_store %arg7[%c9_80, %c0_81, %c0_82], %113 {strides = array<i32>} : memref<11x16x128xf32, #tpu.memory_space<vmem>>, vector<1x16x128xf32>,
    %c10 = arith.constant 10 : index
    %c0_83 = arith.constant 0 : index
    %c0_84 = arith.constant 0 : index
    %114 = vector.load %arg1[%c10, %c0_83, %c0_84] : memref<11x16x128xf32, #tpu.memory_space<vmem>>, vector<1x16x128xf32>
    %115 = vector.shape_cast %114 : vector<1x16x128xf32> to vector<16x128xf32>
    %cst_85 = arith.constant dense<0.000000e+00> : vector<16x128xf32>
    %116 = tpu.matmul %0, %115, %cst_85 {dimension_numbers = #tpu.dot_dimension_numbers<[1], [0], [0], [1], [0, 0, 1, 1], [], []>} : vector<16x16xf32>, vector<16x128xf32>, vector<16x128xf32> -> vector<16x128xf32>
    %117 = arith.addf %116, %3 : vector<16x128xf32>
    %cst_86 = arith.constant 0.000000e+00 : f32
    %cst_87 = arith.constant 4.000000e+00 : f32
    %118 = vector.broadcast %cst_86 : f32 to vector<16x128xf32>
    %119 = arith.maximumf %118, %117 : vector<16x128xf32>
    %120 = vector.broadcast %cst_87 : f32 to vector<16x128xf32>
    %121 = arith.minimumf %120, %119 : vector<16x128xf32>
    %c10_88 = arith.constant 10 : index
    %c0_89 = arith.constant 0 : index
    %c0_90 = arith.constant 0 : index
    %122 = vector.load %arg7[%c10_88, %c0_89, %c0_90] : memref<11x16x128xf32, #tpu.memory_space<vmem>>, vector<1x16x128xf32>
    %123 = vector.shape_cast %122 : vector<1x16x128xf32> to vector<16x128xf32>
    %124 = vector.shape_cast %121 : vector<16x128xf32> to vector<1x16x128xf32>
    tpu.vector_store %arg7[%c10_88, %c0_89, %c0_90], %124 {strides = array<i32>} : memref<11x16x128xf32, #tpu.memory_space<vmem>>, vector<1x16x128xf32>,
    %c0_91 = arith.constant 0 : index
    %125 = memref.load %arg5[%c0_91] : memref<4xf32, #tpu.memory_space<smem>>
    %126 = vector.broadcast %125 : f32 to vector<16x128xf32>
    %c0_92 = arith.constant 0 : index
    %c0_93 = arith.constant 0 : index
    %127 = memref.load %arg4[%c0_92, %c0_93] : memref<4x11xf32, #tpu.memory_space<smem>>
    %c0_94 = arith.constant 0 : index
    %c0_95 = arith.constant 0 : index
    %c0_96 = arith.constant 0 : index
    %128 = vector.load %arg7[%c0_94, %c0_95, %c0_96] : memref<11x16x128xf32, #tpu.memory_space<vmem>>, vector<1x16x128xf32>
    %129 = vector.shape_cast %128 : vector<1x16x128xf32> to vector<16x128xf32>
    %130 = vector.broadcast %127 : f32 to vector<16x128xf32>
    %131 = arith.mulf %130, %129 : vector<16x128xf32>
    %132 = arith.addf %126, %131 : vector<16x128xf32>
    %c0_97 = arith.constant 0 : index
    %c1_98 = arith.constant 1 : index
    %133 = memref.load %arg4[%c0_97, %c1_98] : memref<4x11xf32, #tpu.memory_space<smem>>
    %c1_99 = arith.constant 1 : index
    %c0_100 = arith.constant 0 : index
    %c0_101 = arith.constant 0 : index
    %134 = vector.load %arg7[%c1_99, %c0_100, %c0_101] : memref<11x16x128xf32, #tpu.memory_space<vmem>>, vector<1x16x128xf32>
    %135 = vector.shape_cast %134 : vector<1x16x128xf32> to vector<16x128xf32>
    %136 = vector.broadcast %133 : f32 to vector<16x128xf32>
    %137 = arith.mulf %136, %135 : vector<16x128xf32>
    %138 = arith.addf %132, %137 : vector<16x128xf32>
    %c0_102 = arith.constant 0 : index
    %c2_103 = arith.constant 2 : index
    %139 = memref.load %arg4[%c0_102, %c2_103] : memref<4x11xf32, #tpu.memory_space<smem>>
    %c2_104 = arith.constant 2 : index
    %c0_105 = arith.constant 0 : index
    %c0_106 = arith.constant 0 : index
    %140 = vector.load %arg7[%c2_104, %c0_105, %c0_106] : memref<11x16x128xf32, #tpu.memory_space<vmem>>, vector<1x16x128xf32>
    %141 = vector.shape_cast %140 : vector<1x16x128xf32> to vector<16x128xf32>
    %142 = vector.broadcast %139 : f32 to vector<16x128xf32>
    %143 = arith.mulf %142, %141 : vector<16x128xf32>
    %144 = arith.addf %138, %143 : vector<16x128xf32>
    %c0_107 = arith.constant 0 : index
    %c3_108 = arith.constant 3 : index
    %145 = memref.load %arg4[%c0_107, %c3_108] : memref<4x11xf32, #tpu.memory_space<smem>>
    %c3_109 = arith.constant 3 : index
    %c0_110 = arith.constant 0 : index
    %c0_111 = arith.constant 0 : index
    %146 = vector.load %arg7[%c3_109, %c0_110, %c0_111] : memref<11x16x128xf32, #tpu.memory_space<vmem>>, vector<1x16x128xf32>
    %147 = vector.shape_cast %146 : vector<1x16x128xf32> to vector<16x128xf32>
    %148 = vector.broadcast %145 : f32 to vector<16x128xf32>
    %149 = arith.mulf %148, %147 : vector<16x128xf32>
    %150 = arith.addf %144, %149 : vector<16x128xf32>
    %c0_112 = arith.constant 0 : index
    %c4_113 = arith.constant 4 : index
    %151 = memref.load %arg4[%c0_112, %c4_113] : memref<4x11xf32, #tpu.memory_space<smem>>
    %c4_114 = arith.constant 4 : index
    %c0_115 = arith.constant 0 : index
    %c0_116 = arith.constant 0 : index
    %152 = vector.load %arg7[%c4_114, %c0_115, %c0_116] : memref<11x16x128xf32, #tpu.memory_space<vmem>>, vector<1x16x128xf32>
    %153 = vector.shape_cast %152 : vector<1x16x128xf32> to vector<16x128xf32>
    %154 = vector.broadcast %151 : f32 to vector<16x128xf32>
    %155 = arith.mulf %154, %153 : vector<16x128xf32>
    %156 = arith.addf %150, %155 : vector<16x128xf32>
    %c0_117 = arith.constant 0 : index
    %c5_118 = arith.constant 5 : index
    %157 = memref.load %arg4[%c0_117, %c5_118] : memref<4x11xf32, #tpu.memory_space<smem>>
    %c5_119 = arith.constant 5 : index
    %c0_120 = arith.constant 0 : index
    %c0_121 = arith.constant 0 : index
    %158 = vector.load %arg7[%c5_119, %c0_120, %c0_121] : memref<11x16x128xf32, #tpu.memory_space<vmem>>, vector<1x16x128xf32>
    %159 = vector.shape_cast %158 : vector<1x16x128xf32> to vector<16x128xf32>
    %160 = vector.broadcast %157 : f32 to vector<16x128xf32>
    %161 = arith.mulf %160, %159 : vector<16x128xf32>
    %162 = arith.addf %156, %161 : vector<16x128xf32>
    %c0_122 = arith.constant 0 : index
    %c6_123 = arith.constant 6 : index
    %163 = memref.load %arg4[%c0_122, %c6_123] : memref<4x11xf32, #tpu.memory_space<smem>>
    %c6_124 = arith.constant 6 : index
    %c0_125 = arith.constant 0 : index
    %c0_126 = arith.constant 0 : index
    %164 = vector.load %arg7[%c6_124, %c0_125, %c0_126] : memref<11x16x128xf32, #tpu.memory_space<vmem>>, vector<1x16x128xf32>
    %165 = vector.shape_cast %164 : vector<1x16x128xf32> to vector<16x128xf32>
    %166 = vector.broadcast %163 : f32 to vector<16x128xf32>
    %167 = arith.mulf %166, %165 : vector<16x128xf32>
    %168 = arith.addf %162, %167 : vector<16x128xf32>
    %c0_127 = arith.constant 0 : index
    %c7_128 = arith.constant 7 : index
    %169 = memref.load %arg4[%c0_127, %c7_128] : memref<4x11xf32, #tpu.memory_space<smem>>
    %c7_129 = arith.constant 7 : index
    %c0_130 = arith.constant 0 : index
    %c0_131 = arith.constant 0 : index
    %170 = vector.load %arg7[%c7_129, %c0_130, %c0_131] : memref<11x16x128xf32, #tpu.memory_space<vmem>>, vector<1x16x128xf32>
    %171 = vector.shape_cast %170 : vector<1x16x128xf32> to vector<16x128xf32>
    %172 = vector.broadcast %169 : f32 to vector<16x128xf32>
    %173 = arith.mulf %172, %171 : vector<16x128xf32>
    %174 = arith.addf %168, %173 : vector<16x128xf32>
    %c0_132 = arith.constant 0 : index
    %c8_133 = arith.constant 8 : index
    %175 = memref.load %arg4[%c0_132, %c8_133] : memref<4x11xf32, #tpu.memory_space<smem>>
    %c8_134 = arith.constant 8 : index
    %c0_135 = arith.constant 0 : index
    %c0_136 = arith.constant 0 : index
    %176 = vector.load %arg7[%c8_134, %c0_135, %c0_136] : memref<11x16x128xf32, #tpu.memory_space<vmem>>, vector<1x16x128xf32>
    %177 = vector.shape_cast %176 : vector<1x16x128xf32> to vector<16x128xf32>
    %178 = vector.broadcast %175 : f32 to vector<16x128xf32>
    %179 = arith.mulf %178, %177 : vector<16x128xf32>
    %180 = arith.addf %174, %179 : vector<16x128xf32>
    %c0_137 = arith.constant 0 : index
    %c9_138 = arith.constant 9 : index
    %181 = memref.load %arg4[%c0_137, %c9_138] : memref<4x11xf32, #tpu.memory_space<smem>>
    %c9_139 = arith.constant 9 : index
    %c0_140 = arith.constant 0 : index
    %c0_141 = arith.constant 0 : index
    %182 = vector.load %arg7[%c9_139, %c0_140, %c0_141] : memref<11x16x128xf32, #tpu.memory_space<vmem>>, vector<1x16x128xf32>
    %183 = vector.shape_cast %182 : vector<1x16x128xf32> to vector<16x128xf32>
    %184 = vector.broadcast %181 : f32 to vector<16x128xf32>
    %185 = arith.mulf %184, %183 : vector<16x128xf32>
    %186 = arith.addf %180, %185 : vector<16x128xf32>
    %c0_142 = arith.constant 0 : index
    %c10_143 = arith.constant 10 : index
    %187 = memref.load %arg4[%c0_142, %c10_143] : memref<4x11xf32, #tpu.memory_space<smem>>
    %c10_144 = arith.constant 10 : index
    %c0_145 = arith.constant 0 : index
    %c0_146 = arith.constant 0 : index
    %188 = vector.load %arg7[%c10_144, %c0_145, %c0_146] : memref<11x16x128xf32, #tpu.memory_space<vmem>>, vector<1x16x128xf32>
    %189 = vector.shape_cast %188 : vector<1x16x128xf32> to vector<16x128xf32>
    %190 = vector.broadcast %187 : f32 to vector<16x128xf32>
    %191 = arith.mulf %190, %189 : vector<16x128xf32>
    %192 = arith.addf %186, %191 : vector<16x128xf32>
    %c0_147 = arith.constant 0 : index
    %c0_148 = arith.constant 0 : index
    %c0_149 = arith.constant 0 : index
    %193 = vector.load %arg6[%c0_147, %c0_148, %c0_149] : memref<4x16x128xf32, #tpu.memory_space<vmem>>, vector<1x16x128xf32>
    %194 = vector.shape_cast %193 : vector<1x16x128xf32> to vector<16x128xf32>
    %195 = vector.shape_cast %192 : vector<16x128xf32> to vector<1x16x128xf32>
    tpu.vector_store %arg6[%c0_147, %c0_148, %c0_149], %195 {strides = array<i32>} : memref<4x16x128xf32, #tpu.memory_space<vmem>>, vector<1x16x128xf32>,
    %c1_150 = arith.constant 1 : index
    %196 = memref.load %arg5[%c1_150] : memref<4xf32, #tpu.memory_space<smem>>
    %197 = vector.broadcast %196 : f32 to vector<16x128xf32>
    %c1_151 = arith.constant 1 : index
    %c0_152 = arith.constant 0 : index
    %198 = memref.load %arg4[%c1_151, %c0_152] : memref<4x11xf32, #tpu.memory_space<smem>>
    %c0_153 = arith.constant 0 : index
    %c0_154 = arith.constant 0 : index
    %c0_155 = arith.constant 0 : index
    %199 = vector.load %arg7[%c0_153, %c0_154, %c0_155] : memref<11x16x128xf32, #tpu.memory_space<vmem>>, vector<1x16x128xf32>
    %200 = vector.shape_cast %199 : vector<1x16x128xf32> to vector<16x128xf32>
    %201 = vector.broadcast %198 : f32 to vector<16x128xf32>
    %202 = arith.mulf %201, %200 : vector<16x128xf32>
    %203 = arith.addf %197, %202 : vector<16x128xf32>
    %c1_156 = arith.constant 1 : index
    %c1_157 = arith.constant 1 : index
    %204 = memref.load %arg4[%c1_156, %c1_157] : memref<4x11xf32, #tpu.memory_space<smem>>
    %c1_158 = arith.constant 1 : index
    %c0_159 = arith.constant 0 : index
    %c0_160 = arith.constant 0 : index
    %205 = vector.load %arg7[%c1_158, %c0_159, %c0_160] : memref<11x16x128xf32, #tpu.memory_space<vmem>>, vector<1x16x128xf32>
    %206 = vector.shape_cast %205 : vector<1x16x128xf32> to vector<16x128xf32>
    %207 = vector.broadcast %204 : f32 to vector<16x128xf32>
    %208 = arith.mulf %207, %206 : vector<16x128xf32>
    %209 = arith.addf %203, %208 : vector<16x128xf32>
    %c1_161 = arith.constant 1 : index
    %c2_162 = arith.constant 2 : index
    %210 = memref.load %arg4[%c1_161, %c2_162] : memref<4x11xf32, #tpu.memory_space<smem>>
    %c2_163 = arith.constant 2 : index
    %c0_164 = arith.constant 0 : index
    %c0_165 = arith.constant 0 : index
    %211 = vector.load %arg7[%c2_163, %c0_164, %c0_165] : memref<11x16x128xf32, #tpu.memory_space<vmem>>, vector<1x16x128xf32>
    %212 = vector.shape_cast %211 : vector<1x16x128xf32> to vector<16x128xf32>
    %213 = vector.broadcast %210 : f32 to vector<16x128xf32>
    %214 = arith.mulf %213, %212 : vector<16x128xf32>
    %215 = arith.addf %209, %214 : vector<16x128xf32>
    %c1_166 = arith.constant 1 : index
    %c3_167 = arith.constant 3 : index
    %216 = memref.load %arg4[%c1_166, %c3_167] : memref<4x11xf32, #tpu.memory_space<smem>>
    %c3_168 = arith.constant 3 : index
    %c0_169 = arith.constant 0 : index
    %c0_170 = arith.constant 0 : index
    %217 = vector.load %arg7[%c3_168, %c0_169, %c0_170] : memref<11x16x128xf32, #tpu.memory_space<vmem>>, vector<1x16x128xf32>
    %218 = vector.shape_cast %217 : vector<1x16x128xf32> to vector<16x128xf32>
    %219 = vector.broadcast %216 : f32 to vector<16x128xf32>
    %220 = arith.mulf %219, %218 : vector<16x128xf32>
    %221 = arith.addf %215, %220 : vector<16x128xf32>
    %c1_171 = arith.constant 1 : index
    %c4_172 = arith.constant 4 : index
    %222 = memref.load %arg4[%c1_171, %c4_172] : memref<4x11xf32, #tpu.memory_space<smem>>
    %c4_173 = arith.constant 4 : index
    %c0_174 = arith.constant 0 : index
    %c0_175 = arith.constant 0 : index
    %223 = vector.load %arg7[%c4_173, %c0_174, %c0_175] : memref<11x16x128xf32, #tpu.memory_space<vmem>>, vector<1x16x128xf32>
    %224 = vector.shape_cast %223 : vector<1x16x128xf32> to vector<16x128xf32>
    %225 = vector.broadcast %222 : f32 to vector<16x128xf32>
    %226 = arith.mulf %225, %224 : vector<16x128xf32>
    %227 = arith.addf %221, %226 : vector<16x128xf32>
    %c1_176 = arith.constant 1 : index
    %c5_177 = arith.constant 5 : index
    %228 = memref.load %arg4[%c1_176, %c5_177] : memref<4x11xf32, #tpu.memory_space<smem>>
    %c5_178 = arith.constant 5 : index
    %c0_179 = arith.constant 0 : index
    %c0_180 = arith.constant 0 : index
    %229 = vector.load %arg7[%c5_178, %c0_179, %c0_180] : memref<11x16x128xf32, #tpu.memory_space<vmem>>, vector<1x16x128xf32>
    %230 = vector.shape_cast %229 : vector<1x16x128xf32> to vector<16x128xf32>
    %231 = vector.broadcast %228 : f32 to vector<16x128xf32>
    %232 = arith.mulf %231, %230 : vector<16x128xf32>
    %233 = arith.addf %227, %232 : vector<16x128xf32>
    %c1_181 = arith.constant 1 : index
    %c6_182 = arith.constant 6 : index
    %234 = memref.load %arg4[%c1_181, %c6_182] : memref<4x11xf32, #tpu.memory_space<smem>>
    %c6_183 = arith.constant 6 : index
    %c0_184 = arith.constant 0 : index
    %c0_185 = arith.constant 0 : index
    %235 = vector.load %arg7[%c6_183, %c0_184, %c0_185] : memref<11x16x128xf32, #tpu.memory_space<vmem>>, vector<1x16x128xf32>
    %236 = vector.shape_cast %235 : vector<1x16x128xf32> to vector<16x128xf32>
    %237 = vector.broadcast %234 : f32 to vector<16x128xf32>
    %238 = arith.mulf %237, %236 : vector<16x128xf32>
    %239 = arith.addf %233, %238 : vector<16x128xf32>
    %c1_186 = arith.constant 1 : index
    %c7_187 = arith.constant 7 : index
    %240 = memref.load %arg4[%c1_186, %c7_187] : memref<4x11xf32, #tpu.memory_space<smem>>
    %c7_188 = arith.constant 7 : index
    %c0_189 = arith.constant 0 : index
    %c0_190 = arith.constant 0 : index
    %241 = vector.load %arg7[%c7_188, %c0_189, %c0_190] : memref<11x16x128xf32, #tpu.memory_space<vmem>>, vector<1x16x128xf32>
    %242 = vector.shape_cast %241 : vector<1x16x128xf32> to vector<16x128xf32>
    %243 = vector.broadcast %240 : f32 to vector<16x128xf32>
    %244 = arith.mulf %243, %242 : vector<16x128xf32>
    %245 = arith.addf %239, %244 : vector<16x128xf32>
    %c1_191 = arith.constant 1 : index
    %c8_192 = arith.constant 8 : index
    %246 = memref.load %arg4[%c1_191, %c8_192] : memref<4x11xf32, #tpu.memory_space<smem>>
    %c8_193 = arith.constant 8 : index
    %c0_194 = arith.constant 0 : index
    %c0_195 = arith.constant 0 : index
    %247 = vector.load %arg7[%c8_193, %c0_194, %c0_195] : memref<11x16x128xf32, #tpu.memory_space<vmem>>, vector<1x16x128xf32>
    %248 = vector.shape_cast %247 : vector<1x16x128xf32> to vector<16x128xf32>
    %249 = vector.broadcast %246 : f32 to vector<16x128xf32>
    %250 = arith.mulf %249, %248 : vector<16x128xf32>
    %251 = arith.addf %245, %250 : vector<16x128xf32>
    %c1_196 = arith.constant 1 : index
    %c9_197 = arith.constant 9 : index
    %252 = memref.load %arg4[%c1_196, %c9_197] : memref<4x11xf32, #tpu.memory_space<smem>>
    %c9_198 = arith.constant 9 : index
    %c0_199 = arith.constant 0 : index
    %c0_200 = arith.constant 0 : index
    %253 = vector.load %arg7[%c9_198, %c0_199, %c0_200] : memref<11x16x128xf32, #tpu.memory_space<vmem>>, vector<1x16x128xf32>
    %254 = vector.shape_cast %253 : vector<1x16x128xf32> to vector<16x128xf32>
    %255 = vector.broadcast %252 : f32 to vector<16x128xf32>
    %256 = arith.mulf %255, %254 : vector<16x128xf32>
    %257 = arith.addf %251, %256 : vector<16x128xf32>
    %c1_201 = arith.constant 1 : index
    %c10_202 = arith.constant 10 : index
    %258 = memref.load %arg4[%c1_201, %c10_202] : memref<4x11xf32, #tpu.memory_space<smem>>
    %c10_203 = arith.constant 10 : index
    %c0_204 = arith.constant 0 : index
    %c0_205 = arith.constant 0 : index
    %259 = vector.load %arg7[%c10_203, %c0_204, %c0_205] : memref<11x16x128xf32, #tpu.memory_space<vmem>>, vector<1x16x128xf32>
    %260 = vector.shape_cast %259 : vector<1x16x128xf32> to vector<16x128xf32>
    %261 = vector.broadcast %258 : f32 to vector<16x128xf32>
    %262 = arith.mulf %261, %260 : vector<16x128xf32>
    %263 = arith.addf %257, %262 : vector<16x128xf32>
    %c1_206 = arith.constant 1 : index
    %c0_207 = arith.constant 0 : index
    %c0_208 = arith.constant 0 : index
    %264 = vector.load %arg6[%c1_206, %c0_207, %c0_208] : memref<4x16x128xf32, #tpu.memory_space<vmem>>, vector<1x16x128xf32>
    %265 = vector.shape_cast %264 : vector<1x16x128xf32> to vector<16x128xf32>
    %266 = vector.shape_cast %263 : vector<16x128xf32> to vector<1x16x128xf32>
    tpu.vector_store %arg6[%c1_206, %c0_207, %c0_208], %266 {strides = array<i32>} : memref<4x16x128xf32, #tpu.memory_space<vmem>>, vector<1x16x128xf32>,
    %c2_209 = arith.constant 2 : index
    %267 = memref.load %arg5[%c2_209] : memref<4xf32, #tpu.memory_space<smem>>
    %268 = vector.broadcast %267 : f32 to vector<16x128xf32>
    %c2_210 = arith.constant 2 : index
    %c0_211 = arith.constant 0 : index
    %269 = memref.load %arg4[%c2_210, %c0_211] : memref<4x11xf32, #tpu.memory_space<smem>>
    %c0_212 = arith.constant 0 : index
    %c0_213 = arith.constant 0 : index
    %c0_214 = arith.constant 0 : index
    %270 = vector.load %arg7[%c0_212, %c0_213, %c0_214] : memref<11x16x128xf32, #tpu.memory_space<vmem>>, vector<1x16x128xf32>
    %271 = vector.shape_cast %270 : vector<1x16x128xf32> to vector<16x128xf32>
    %272 = vector.broadcast %269 : f32 to vector<16x128xf32>
    %273 = arith.mulf %272, %271 : vector<16x128xf32>
    %274 = arith.addf %268, %273 : vector<16x128xf32>
    %c2_215 = arith.constant 2 : index
    %c1_216 = arith.constant 1 : index
    %275 = memref.load %arg4[%c2_215, %c1_216] : memref<4x11xf32, #tpu.memory_space<smem>>
    %c1_217 = arith.constant 1 : index
    %c0_218 = arith.constant 0 : index
    %c0_219 = arith.constant 0 : index
    %276 = vector.load %arg7[%c1_217, %c0_218, %c0_219] : memref<11x16x128xf32, #tpu.memory_space<vmem>>, vector<1x16x128xf32>
    %277 = vector.shape_cast %276 : vector<1x16x128xf32> to vector<16x128xf32>
    %278 = vector.broadcast %275 : f32 to vector<16x128xf32>
    %279 = arith.mulf %278, %277 : vector<16x128xf32>
    %280 = arith.addf %274, %279 : vector<16x128xf32>
    %c2_220 = arith.constant 2 : index
    %c2_221 = arith.constant 2 : index
    %281 = memref.load %arg4[%c2_220, %c2_221] : memref<4x11xf32, #tpu.memory_space<smem>>
    %c2_222 = arith.constant 2 : index
    %c0_223 = arith.constant 0 : index
    %c0_224 = arith.constant 0 : index
    %282 = vector.load %arg7[%c2_222, %c0_223, %c0_224] : memref<11x16x128xf32, #tpu.memory_space<vmem>>, vector<1x16x128xf32>
    %283 = vector.shape_cast %282 : vector<1x16x128xf32> to vector<16x128xf32>
    %284 = vector.broadcast %281 : f32 to vector<16x128xf32>
    %285 = arith.mulf %284, %283 : vector<16x128xf32>
    %286 = arith.addf %280, %285 : vector<16x128xf32>
    %c2_225 = arith.constant 2 : index
    %c3_226 = arith.constant 3 : index
    %287 = memref.load %arg4[%c2_225, %c3_226] : memref<4x11xf32, #tpu.memory_space<smem>>
    %c3_227 = arith.constant 3 : index
    %c0_228 = arith.constant 0 : index
    %c0_229 = arith.constant 0 : index
    %288 = vector.load %arg7[%c3_227, %c0_228, %c0_229] : memref<11x16x128xf32, #tpu.memory_space<vmem>>, vector<1x16x128xf32>
    %289 = vector.shape_cast %288 : vector<1x16x128xf32> to vector<16x128xf32>
    %290 = vector.broadcast %287 : f32 to vector<16x128xf32>
    %291 = arith.mulf %290, %289 : vector<16x128xf32>
    %292 = arith.addf %286, %291 : vector<16x128xf32>
    %c2_230 = arith.constant 2 : index
    %c4_231 = arith.constant 4 : index
    %293 = memref.load %arg4[%c2_230, %c4_231] : memref<4x11xf32, #tpu.memory_space<smem>>
    %c4_232 = arith.constant 4 : index
    %c0_233 = arith.constant 0 : index
    %c0_234 = arith.constant 0 : index
    %294 = vector.load %arg7[%c4_232, %c0_233, %c0_234] : memref<11x16x128xf32, #tpu.memory_space<vmem>>, vector<1x16x128xf32>
    %295 = vector.shape_cast %294 : vector<1x16x128xf32> to vector<16x128xf32>
    %296 = vector.broadcast %293 : f32 to vector<16x128xf32>
    %297 = arith.mulf %296, %295 : vector<16x128xf32>
    %298 = arith.addf %292, %297 : vector<16x128xf32>
    %c2_235 = arith.constant 2 : index
    %c5_236 = arith.constant 5 : index
    %299 = memref.load %arg4[%c2_235, %c5_236] : memref<4x11xf32, #tpu.memory_space<smem>>
    %c5_237 = arith.constant 5 : index
    %c0_238 = arith.constant 0 : index
    %c0_239 = arith.constant 0 : index
    %300 = vector.load %arg7[%c5_237, %c0_238, %c0_239] : memref<11x16x128xf32, #tpu.memory_space<vmem>>, vector<1x16x128xf32>
    %301 = vector.shape_cast %300 : vector<1x16x128xf32> to vector<16x128xf32>
    %302 = vector.broadcast %299 : f32 to vector<16x128xf32>
    %303 = arith.mulf %302, %301 : vector<16x128xf32>
    %304 = arith.addf %298, %303 : vector<16x128xf32>
    %c2_240 = arith.constant 2 : index
    %c6_241 = arith.constant 6 : index
    %305 = memref.load %arg4[%c2_240, %c6_241] : memref<4x11xf32, #tpu.memory_space<smem>>
    %c6_242 = arith.constant 6 : index
    %c0_243 = arith.constant 0 : index
    %c0_244 = arith.constant 0 : index
    %306 = vector.load %arg7[%c6_242, %c0_243, %c0_244] : memref<11x16x128xf32, #tpu.memory_space<vmem>>, vector<1x16x128xf32>
    %307 = vector.shape_cast %306 : vector<1x16x128xf32> to vector<16x128xf32>
    %308 = vector.broadcast %305 : f32 to vector<16x128xf32>
    %309 = arith.mulf %308, %307 : vector<16x128xf32>
    %310 = arith.addf %304, %309 : vector<16x128xf32>
    %c2_245 = arith.constant 2 : index
    %c7_246 = arith.constant 7 : index
    %311 = memref.load %arg4[%c2_245, %c7_246] : memref<4x11xf32, #tpu.memory_space<smem>>
    %c7_247 = arith.constant 7 : index
    %c0_248 = arith.constant 0 : index
    %c0_249 = arith.constant 0 : index
    %312 = vector.load %arg7[%c7_247, %c0_248, %c0_249] : memref<11x16x128xf32, #tpu.memory_space<vmem>>, vector<1x16x128xf32>
    %313 = vector.shape_cast %312 : vector<1x16x128xf32> to vector<16x128xf32>
    %314 = vector.broadcast %311 : f32 to vector<16x128xf32>
    %315 = arith.mulf %314, %313 : vector<16x128xf32>
    %316 = arith.addf %310, %315 : vector<16x128xf32>
    %c2_250 = arith.constant 2 : index
    %c8_251 = arith.constant 8 : index
    %317 = memref.load %arg4[%c2_250, %c8_251] : memref<4x11xf32, #tpu.memory_space<smem>>
    %c8_252 = arith.constant 8 : index
    %c0_253 = arith.constant 0 : index
    %c0_254 = arith.constant 0 : index
    %318 = vector.load %arg7[%c8_252, %c0_253, %c0_254] : memref<11x16x128xf32, #tpu.memory_space<vmem>>, vector<1x16x128xf32>
    %319 = vector.shape_cast %318 : vector<1x16x128xf32> to vector<16x128xf32>
    %320 = vector.broadcast %317 : f32 to vector<16x128xf32>
    %321 = arith.mulf %320, %319 : vector<16x128xf32>
    %322 = arith.addf %316, %321 : vector<16x128xf32>
    %c2_255 = arith.constant 2 : index
    %c9_256 = arith.constant 9 : index
    %323 = memref.load %arg4[%c2_255, %c9_256] : memref<4x11xf32, #tpu.memory_space<smem>>
    %c9_257 = arith.constant 9 : index
    %c0_258 = arith.constant 0 : index
    %c0_259 = arith.constant 0 : index
    %324 = vector.load %arg7[%c9_257, %c0_258, %c0_259] : memref<11x16x128xf32, #tpu.memory_space<vmem>>, vector<1x16x128xf32>
    %325 = vector.shape_cast %324 : vector<1x16x128xf32> to vector<16x128xf32>
    %326 = vector.broadcast %323 : f32 to vector<16x128xf32>
    %327 = arith.mulf %326, %325 : vector<16x128xf32>
    %328 = arith.addf %322, %327 : vector<16x128xf32>
    %c2_260 = arith.constant 2 : index
    %c10_261 = arith.constant 10 : index
    %329 = memref.load %arg4[%c2_260, %c10_261] : memref<4x11xf32, #tpu.memory_space<smem>>
    %c10_262 = arith.constant 10 : index
    %c0_263 = arith.constant 0 : index
    %c0_264 = arith.constant 0 : index
    %330 = vector.load %arg7[%c10_262, %c0_263, %c0_264] : memref<11x16x128xf32, #tpu.memory_space<vmem>>, vector<1x16x128xf32>
    %331 = vector.shape_cast %330 : vector<1x16x128xf32> to vector<16x128xf32>
    %332 = vector.broadcast %329 : f32 to vector<16x128xf32>
    %333 = arith.mulf %332, %331 : vector<16x128xf32>
    %334 = arith.addf %328, %333 : vector<16x128xf32>
    %c2_265 = arith.constant 2 : index
    %c0_266 = arith.constant 0 : index
    %c0_267 = arith.constant 0 : index
    %335 = vector.load %arg6[%c2_265, %c0_266, %c0_267] : memref<4x16x128xf32, #tpu.memory_space<vmem>>, vector<1x16x128xf32>
    %336 = vector.shape_cast %335 : vector<1x16x128xf32> to vector<16x128xf32>
    %337 = vector.shape_cast %334 : vector<16x128xf32> to vector<1x16x128xf32>
    tpu.vector_store %arg6[%c2_265, %c0_266, %c0_267], %337 {strides = array<i32>} : memref<4x16x128xf32, #tpu.memory_space<vmem>>, vector<1x16x128xf32>,
    %c3_268 = arith.constant 3 : index
    %338 = memref.load %arg5[%c3_268] : memref<4xf32, #tpu.memory_space<smem>>
    %339 = vector.broadcast %338 : f32 to vector<16x128xf32>
    %c3_269 = arith.constant 3 : index
    %c0_270 = arith.constant 0 : index
    %340 = memref.load %arg4[%c3_269, %c0_270] : memref<4x11xf32, #tpu.memory_space<smem>>
    %c0_271 = arith.constant 0 : index
    %c0_272 = arith.constant 0 : index
    %c0_273 = arith.constant 0 : index
    %341 = vector.load %arg7[%c0_271, %c0_272, %c0_273] : memref<11x16x128xf32, #tpu.memory_space<vmem>>, vector<1x16x128xf32>
    %342 = vector.shape_cast %341 : vector<1x16x128xf32> to vector<16x128xf32>
    %343 = vector.broadcast %340 : f32 to vector<16x128xf32>
    %344 = arith.mulf %343, %342 : vector<16x128xf32>
    %345 = arith.addf %339, %344 : vector<16x128xf32>
    %c3_274 = arith.constant 3 : index
    %c1_275 = arith.constant 1 : index
    %346 = memref.load %arg4[%c3_274, %c1_275] : memref<4x11xf32, #tpu.memory_space<smem>>
    %c1_276 = arith.constant 1 : index
    %c0_277 = arith.constant 0 : index
    %c0_278 = arith.constant 0 : index
    %347 = vector.load %arg7[%c1_276, %c0_277, %c0_278] : memref<11x16x128xf32, #tpu.memory_space<vmem>>, vector<1x16x128xf32>
    %348 = vector.shape_cast %347 : vector<1x16x128xf32> to vector<16x128xf32>
    %349 = vector.broadcast %346 : f32 to vector<16x128xf32>
    %350 = arith.mulf %349, %348 : vector<16x128xf32>
    %351 = arith.addf %345, %350 : vector<16x128xf32>
    %c3_279 = arith.constant 3 : index
    %c2_280 = arith.constant 2 : index
    %352 = memref.load %arg4[%c3_279, %c2_280] : memref<4x11xf32, #tpu.memory_space<smem>>
    %c2_281 = arith.constant 2 : index
    %c0_282 = arith.constant 0 : index
    %c0_283 = arith.constant 0 : index
    %353 = vector.load %arg7[%c2_281, %c0_282, %c0_283] : memref<11x16x128xf32, #tpu.memory_space<vmem>>, vector<1x16x128xf32>
    %354 = vector.shape_cast %353 : vector<1x16x128xf32> to vector<16x128xf32>
    %355 = vector.broadcast %352 : f32 to vector<16x128xf32>
    %356 = arith.mulf %355, %354 : vector<16x128xf32>
    %357 = arith.addf %351, %356 : vector<16x128xf32>
    %c3_284 = arith.constant 3 : index
    %c3_285 = arith.constant 3 : index
    %358 = memref.load %arg4[%c3_284, %c3_285] : memref<4x11xf32, #tpu.memory_space<smem>>
    %c3_286 = arith.constant 3 : index
    %c0_287 = arith.constant 0 : index
    %c0_288 = arith.constant 0 : index
    %359 = vector.load %arg7[%c3_286, %c0_287, %c0_288] : memref<11x16x128xf32, #tpu.memory_space<vmem>>, vector<1x16x128xf32>
    %360 = vector.shape_cast %359 : vector<1x16x128xf32> to vector<16x128xf32>
    %361 = vector.broadcast %358 : f32 to vector<16x128xf32>
    %362 = arith.mulf %361, %360 : vector<16x128xf32>
    %363 = arith.addf %357, %362 : vector<16x128xf32>
    %c3_289 = arith.constant 3 : index
    %c4_290 = arith.constant 4 : index
    %364 = memref.load %arg4[%c3_289, %c4_290] : memref<4x11xf32, #tpu.memory_space<smem>>
    %c4_291 = arith.constant 4 : index
    %c0_292 = arith.constant 0 : index
    %c0_293 = arith.constant 0 : index
    %365 = vector.load %arg7[%c4_291, %c0_292, %c0_293] : memref<11x16x128xf32, #tpu.memory_space<vmem>>, vector<1x16x128xf32>
    %366 = vector.shape_cast %365 : vector<1x16x128xf32> to vector<16x128xf32>
    %367 = vector.broadcast %364 : f32 to vector<16x128xf32>
    %368 = arith.mulf %367, %366 : vector<16x128xf32>
    %369 = arith.addf %363, %368 : vector<16x128xf32>
    %c3_294 = arith.constant 3 : index
    %c5_295 = arith.constant 5 : index
    %370 = memref.load %arg4[%c3_294, %c5_295] : memref<4x11xf32, #tpu.memory_space<smem>>
    %c5_296 = arith.constant 5 : index
    %c0_297 = arith.constant 0 : index
    %c0_298 = arith.constant 0 : index
    %371 = vector.load %arg7[%c5_296, %c0_297, %c0_298] : memref<11x16x128xf32, #tpu.memory_space<vmem>>, vector<1x16x128xf32>
    %372 = vector.shape_cast %371 : vector<1x16x128xf32> to vector<16x128xf32>
    %373 = vector.broadcast %370 : f32 to vector<16x128xf32>
    %374 = arith.mulf %373, %372 : vector<16x128xf32>
    %375 = arith.addf %369, %374 : vector<16x128xf32>
    %c3_299 = arith.constant 3 : index
    %c6_300 = arith.constant 6 : index
    %376 = memref.load %arg4[%c3_299, %c6_300] : memref<4x11xf32, #tpu.memory_space<smem>>
    %c6_301 = arith.constant 6 : index
    %c0_302 = arith.constant 0 : index
    %c0_303 = arith.constant 0 : index
    %377 = vector.load %arg7[%c6_301, %c0_302, %c0_303] : memref<11x16x128xf32, #tpu.memory_space<vmem>>, vector<1x16x128xf32>
    %378 = vector.shape_cast %377 : vector<1x16x128xf32> to vector<16x128xf32>
    %379 = vector.broadcast %376 : f32 to vector<16x128xf32>
    %380 = arith.mulf %379, %378 : vector<16x128xf32>
    %381 = arith.addf %375, %380 : vector<16x128xf32>
    %c3_304 = arith.constant 3 : index
    %c7_305 = arith.constant 7 : index
    %382 = memref.load %arg4[%c3_304, %c7_305] : memref<4x11xf32, #tpu.memory_space<smem>>
    %c7_306 = arith.constant 7 : index
    %c0_307 = arith.constant 0 : index
    %c0_308 = arith.constant 0 : index
    %383 = vector.load %arg7[%c7_306, %c0_307, %c0_308] : memref<11x16x128xf32, #tpu.memory_space<vmem>>, vector<1x16x128xf32>
    %384 = vector.shape_cast %383 : vector<1x16x128xf32> to vector<16x128xf32>
    %385 = vector.broadcast %382 : f32 to vector<16x128xf32>
    %386 = arith.mulf %385, %384 : vector<16x128xf32>
    %387 = arith.addf %381, %386 : vector<16x128xf32>
    %c3_309 = arith.constant 3 : index
    %c8_310 = arith.constant 8 : index
    %388 = memref.load %arg4[%c3_309, %c8_310] : memref<4x11xf32, #tpu.memory_space<smem>>
    %c8_311 = arith.constant 8 : index
    %c0_312 = arith.constant 0 : index
    %c0_313 = arith.constant 0 : index
    %389 = vector.load %arg7[%c8_311, %c0_312, %c0_313] : memref<11x16x128xf32, #tpu.memory_space<vmem>>, vector<1x16x128xf32>
    %390 = vector.shape_cast %389 : vector<1x16x128xf32> to vector<16x128xf32>
    %391 = vector.broadcast %388 : f32 to vector<16x128xf32>
    %392 = arith.mulf %391, %390 : vector<16x128xf32>
    %393 = arith.addf %387, %392 : vector<16x128xf32>
    %c3_314 = arith.constant 3 : index
    %c9_315 = arith.constant 9 : index
    %394 = memref.load %arg4[%c3_314, %c9_315] : memref<4x11xf32, #tpu.memory_space<smem>>
    %c9_316 = arith.constant 9 : index
    %c0_317 = arith.constant 0 : index
    %c0_318 = arith.constant 0 : index
    %395 = vector.load %arg7[%c9_316, %c0_317, %c0_318] : memref<11x16x128xf32, #tpu.memory_space<vmem>>, vector<1x16x128xf32>
    %396 = vector.shape_cast %395 : vector<1x16x128xf32> to vector<16x128xf32>
    %397 = vector.broadcast %394 : f32 to vector<16x128xf32>
    %398 = arith.mulf %397, %396 : vector<16x128xf32>
    %399 = arith.addf %393, %398 : vector<16x128xf32>
    %c3_319 = arith.constant 3 : index
    %c10_320 = arith.constant 10 : index
    %400 = memref.load %arg4[%c3_319, %c10_320] : memref<4x11xf32, #tpu.memory_space<smem>>
    %c10_321 = arith.constant 10 : index
    %c0_322 = arith.constant 0 : index
    %c0_323 = arith.constant 0 : index
    %401 = vector.load %arg7[%c10_321, %c0_322, %c0_323] : memref<11x16x128xf32, #tpu.memory_space<vmem>>, vector<1x16x128xf32>
    %402 = vector.shape_cast %401 : vector<1x16x128xf32> to vector<16x128xf32>
    %403 = vector.broadcast %400 : f32 to vector<16x128xf32>
    %404 = arith.mulf %403, %402 : vector<16x128xf32>
    %405 = arith.addf %399, %404 : vector<16x128xf32>
    %c3_324 = arith.constant 3 : index
    %c0_325 = arith.constant 0 : index
    %c0_326 = arith.constant 0 : index
    %406 = vector.load %arg6[%c3_324, %c0_325, %c0_326] : memref<4x16x128xf32, #tpu.memory_space<vmem>>, vector<1x16x128xf32>
    %407 = vector.shape_cast %406 : vector<1x16x128xf32> to vector<16x128xf32>
    %408 = vector.shape_cast %405 : vector<16x128xf32> to vector<1x16x128xf32>
    tpu.vector_store %arg6[%c3_324, %c0_325, %c0_326], %408 {strides = array<i32>} : memref<4x16x128xf32, #tpu.memory_space<vmem>>, vector<1x16x128xf32>,
    return
  }
  func.func @transform_0(%arg0: i32) -> (i32, i32, i32) {
    %c0_i32 = arith.constant 0 : i32
    %c0_i32_0 = arith.constant 0 : i32
    %c0_i32_1 = arith.constant 0 : i32
    return %c0_i32, %c0_i32_0, %arg0 : i32, i32, i32
  }
  func.func @transform_1(%arg0: i32) -> (i32, i32) {
    %c0_i32 = arith.constant 0 : i32
    %c0_i32_0 = arith.constant 0 : i32
    %c0_i32_1 = arith.constant 0 : i32
    return %c0_i32, %c0_i32_0 : i32, i32
  }
  func.func @transform_2(%arg0: i32) -> (i32, i32) {
    %c0_i32 = arith.constant 0 : i32
    %c0_i32_0 = arith.constant 0 : i32
    %c0_i32_1 = arith.constant 0 : i32
    return %c0_i32, %c0_i32_0 : i32, i32
  }
  func.func @transform_3(%arg0: i32) -> (i32, i32) {
    %c0_i32 = arith.constant 0 : i32
    %c0_i32_0 = arith.constant 0 : i32
    %c0_i32_1 = arith.constant 0 : i32
    return %c0_i32, %c0_i32_0 : i32, i32
  }
  func.func @transform_4(%arg0: i32) -> i32 {
    %c0_i32 = arith.constant 0 : i32
    %c0_i32_0 = arith.constant 0 : i32
    return %c0_i32 : i32
  }
  func.func @transform_5(%arg0: i32) -> (i32, i32, i32) {
    %c0_i32 = arith.constant 0 : i32
    %c0_i32_0 = arith.constant 0 : i32
    %c0_i32_1 = arith.constant 0 : i32
    return %c0_i32, %c0_i32_0, %arg0 : i32, i32, i32
  }
}

</mosaic_0001>

<bundles_post_ra>
// kernel: tpu_custom_call.1
= control target key start
LH: loop header
LB: loop body
LE: loop exit
PB: predicated region body
PF: predicated region fallthrough
CT: control target
= control target key end

     0   :  { %s2207_s0 = inlined_call_operand.hbm [shape: f32[11,16,128], index: 0, kind: input, shape index: {}]   ;;  %s2208_s1 = inlined_call_operand.vmem [shape: f32[16,16], index: 1, kind: input, shape index: {}]   ;;  %s2209_s2 = inlined_call_operand.vmem [shape: f32[16,1], index: 2, kind: input, shape index: {}]   ;;  %s2210_s3 = inlined_call_operand.vmem [shape: f32[4,11], index: 3, kind: input, shape index: {}]   ;;  %s2211_s4 = inlined_call_operand.vmem [shape: f32[4], index: 4, kind: input, shape index: {}]   ;;  %s2212_s5 = inlined_call_operand.hbm [shape: f32[4,16,128], index: 5, kind: output, shape index: {}]  }
   0x1   :  { %2265 = sst [smem:[#allocation39_spill]] %s2212_s5 }
   0x2   :  { %10 = vsyncpa [#allocation4], 0 }
   0x3   :  { %11 = vsyncpa [#allocation6], 0 }
   0x4   :  { %12 = vsyncpa [#allocation9], 0 }
   0x5   :  { %13 = vsyncpa [#allocation5], 0  ;;  %s1721_s18 = smov [#allocation3]   ;;  %s36_s22 = sshll.u32 %s2210_s3, 4  ;;  %s37_s22 = int_to_ptr.vmem [resolvable:$true] %s36_s22 }
   0x6   :  { %s19_s19 = sshll.u32 %s1721_s18, 4  ;;  %s1645_s25 = scalar_lea.hbm %s2207_s0, 2816  ;;  %s20_s19 = int_to_ptr.vmem [resolvable:$true] %s19_s19 }
   0x7   :  { %p1646_p0 = scmp.ne.s32.totalorder %s2207_s0, %s1645_s25  ;;  %p1649_p1 = scmp.lt.u32.totalorder %s1645_s25, %s2207_s0 }
   0x9   :  { %p1651_p2 = pnand %p1649_p1, %p1646_p0 }
   0xb   :  { %1654 = shalt.err (!%p1651_p2)
}
   0xc   :  { %s1655_s30 = scalar_lea.vmem %s20_s19, 2816  ;;  %p1660_p4 = scmp.lt.s32.totalorder %s20_s19, %s20_s19 }
   0xd   :  { %p1656_p3 = scmp.ne.s32.totalorder %s20_s19, %s1655_s30  ;;  %p1661_p5 = scmp.lt.s32.totalorder %s1655_s30, %s1655_s30 }
   0xf   :  { %p1662_p6 = por %p1661_p5, %p1660_p4 }
  0x11   :  { %p1663_p7 = pnand %p1662_p6, %p1656_p3 }
  0x13   :  { %1666 = shalt.err (!%p1663_p7)
}
  0x14   :  { %s2213_s3 = smov 128   ;;  %s2214_s6 = smov 8  }
  0x15   :  { %25 = dma.hbm_to_vmem [thread:$0]  %s2207_s0, 2816, %s20_s19, [#allocation4], %s2213_s3, %s2213_s3, %s2214_s6  }
  0x16   :  { %s1667_s9 = scalar_lea.vmem %s37_s22, 64  ;;  %p1672_p9 = scmp.lt.s32.totalorder %s37_s22, %s37_s22 }
  0x17   :  { %p1668_p8 = scmp.ne.s32.totalorder %s37_s22, %s1667_s9  ;;  %p1673_p10 = scmp.lt.s32.totalorder %s1667_s9, %s1667_s9 }
  0x19   :  { %p1674_p11 = por %p1673_p10, %p1672_p9 }
  0x1b   :  { %p1675_p12 = pnand %p1674_p11, %p1668_p8 }
  0x1d   :  { %1678 = shalt.err (!%p1675_p12)
}
  0x1e   :  { %s1724_s10 = smov [#allocation7]   ;;  %s46_s13 = sshll.u32 %s2211_s4, 4  ;;  %s47_s13 = int_to_ptr.vmem [resolvable:$true] %s46_s13 }
  0x1f   :  { %39 = dma.vmem_to_smem %s37_s22, 64, %s1724_s10, [#allocation6]  }
  0x20   :  { %s1679_s14 = scalar_lea.vmem %s47_s13, 16  ;;  %p1684_p0 = scmp.lt.s32.totalorder %s47_s13, %s47_s13 }
  0x21   :  { %p1680_p13 = scmp.ne.s32.totalorder %s47_s13, %s1679_s14  ;;  %p1685_p1 = scmp.lt.s32.totalorder %s1679_s14, %s1679_s14 }
  0x23   :  { %p1686_p2 = por %p1685_p1, %p1684_p0 }
  0x25   :  { %p1687_p3 = pnand %p1686_p2, %p1680_p13 }
  0x27   :  { %1690 = shalt.err (!%p1687_p3)
}
  0x28   :  { %s1725_s0 = smov [#allocation8]  }
  0x29   :  { %49 = dma.vmem_to_smem %s47_s13, 16, %s1725_s0, [#allocation9]  }
  0x2a   :  { %1713 = dma.done.wait [#allocation4], 2816  }
  0x2b   :  { %1714 = vsyncadd [#allocation4], 4294964480 }
  0x2c   :  { %1715 = dma.done.wait [#allocation6], 64  }
  0x2d   :  { %1716 = vsyncadd [#allocation6], 4294967232 }
  0x2e   :  { %1717 = dma.done.wait [#allocation9], 16  }
  0x2f   :  { %1718 = vsyncadd [#allocation9], 4294967280 }
  0x30   :  { %59 = sfence }
  0x31   :  { %v74_v0 = vld [vmem:[#allocation3] sm:$0xff]  ;;  %v75_v1 = vld [vmem:[#allocation3 + $0x8] sm:$0xff]  ;;  %v165_v2 = vld [vmem:[#allocation3 + $0x10] sm:$0xff]  ;;  %vm76_vm0 = vcmask 130048   ;;  %v1726_v6 = vmov 0   ;;  %s1826_s21 = sld [smem:[#allocation7]] }
  0x32   :  { %v1593_v3 = vpack.c.bf16 %v75_v1, %v74_v0  ;;  %v166_v4 = vld [vmem:[#allocation3 + $0x18] sm:$0xff]  ;;  %v1782_v5 = vld [vmem:[%s2208_s1] sm:$0xff]  ;;  %1644 = vset.pattern.permute.xlu0 %v1726_v6  ;;  %v251_v9 = vld [vmem:[#allocation3 + $0x28] sm:$0xff]  ;;  %s1828_s22 = sld [smem:[#allocation7 + $0x80]]  ;;  %s1836_s26 = sld [smem:[#allocation8 + $0x1]] }
  0x33   :  { %v1597_v7 = vpack.c.bf16 %v166_v4, %v165_v2  ;;  %1520 = vmatprep.mubr.msk.f32.mxu0 %vm76_vm0, %v1782_v5  ;;  %1527 = vmatprep.mubr.msk.f32.mxu1 %vm76_vm0, %v1782_v5  ;;  %v250_v8 = vld [vmem:[#allocation3 + $0x20] sm:$0xff]  ;;  %v335_v10 = vld [vmem:[#allocation3 + $0x30] sm:$0xff]  ;;  %v336_v12 = vld [vmem:[#allocation3 + $0x38] sm:$0xff]  ;;  %s1830_s23 = sld [smem:[#allocation7 + $0x100]]  ;;  %s1838_s27 = sld [smem:[#allocation8 + $0x2]] }
  0x34   :  { %1594 = vmatprep.subr.bf16.mxu0 %v1593_v3  ;;  %v1601_v11 = vpack.c.bf16 %v251_v9, %v250_v8  ;;  %v420_v13 = vld [vmem:[#allocation3 + $0x40] sm:$0xff]  ;;  %v421_v14 = vld [vmem:[#allocation3 + $0x48] sm:$0xff]  ;;  %v1605_v16 = vpack.c.bf16 %v336_v12, %v335_v10  ;;  %v505_v17 = vld [vmem:[#allocation3 + $0x50] sm:$0xff]  ;;  %s1832_s24 = sld [smem:[#allocation7 + $0x180]]  ;;  %s1842_s28 = sld [smem:[#allocation7 + $0x1]] }
  0x35   :  { %1598 = vmatprep.subr.bf16.mxu1 %v1597_v7  ;;  %1596 = vmatpush3.bf16.msra.mxu0 %v1593_v3  ;;  %v61_v15 = vld [vmem:[%s2208_s1 + $0x8] sm:$0xff]  ;;  %v506_v18 = vld [vmem:[#allocation3 + $0x58] sm:$0xff]  ;;  %v1609_v19 = vpack.c.bf16 %v421_v14, %v420_v13  ;;  %v590_v21 = vld [vmem:[#allocation3 + $0x60] sm:$0xff]  ;;  %s1834_s25 = sld [smem:[#allocation8]]  ;;  %s1844_s29 = sld [smem:[#allocation7 + $0x81]] }
  0x36   :  { %1600 = vmatpush3.bf16.msra.mxu1 %v1597_v7  ;;  %1602 = vmatprep.subr.bf16.mxu0 %v1601_v11  ;;  %v1613_v20 = vpack.c.bf16 %v506_v18, %v505_v17  ;;  %v591_v22 = vld [vmem:[#allocation3 + $0x68] sm:$0xff]  ;;  %v675_v23 = vld [vmem:[#allocation3 + $0x70] sm:$0xff]  ;;  %v676_v24 = vld [vmem:[#allocation3 + $0x78] sm:$0xff]  ;;  %s1846_s30 = sld [smem:[#allocation7 + $0x101]]  ;;  %s1850_s8 = sld [smem:[#allocation7 + $0x2]] }
  0x37   :  { %1606 = vmatprep.subr.bf16.mxu1 %v1605_v16  ;;  %v1617_v25 = vpack.c.bf16 %v591_v22, %v590_v21  ;;  %v1621_v26 = vpack.c.bf16 %v676_v24, %v675_v23  ;;  %v760_v27 = vld [vmem:[#allocation3 + $0x80] sm:$0xff]  ;;  %v761_v28 = vld [vmem:[#allocation3 + $0x88] sm:$0xff]  ;;  %v845_v29 = vld [vmem:[#allocation3 + $0x90] sm:$0xff]  ;;  %s1848_s7 = sld [smem:[#allocation7 + $0x181]]  ;;  %s1852_s9 = sld [smem:[#allocation7 + $0x82]]  ;;  %v1019_v38 = vstv %s1826_s21 }
  0x38   :  { %1521 = vmatmul.mubr.msk.f32.vlgmr.msra.gmra.mrb[0].mxu0 %vm76_vm0, %v61_v15  ;;  %v846_v30 = vld [vmem:[#allocation3 + $0x98] sm:$0xff]  ;;  %v1625_v31 = vpack.c.bf16 %v761_v28, %v760_v27  ;;  %v930_v33 = vld [vmem:[#allocation3 + $0xa0] sm:$0xff]  ;;  %v931_v34 = vld [vmem:[#allocation3 + $0xa8] sm:$0xff]  ;;  %2266 = sst [smem:[#allocation15_spill]] %s1828_s22  ;;  %s1854_s10 = sld [smem:[#allocation7 + $0x102]]  ;;  %v1111_v40 = vstv %s1828_s22  ;;  %v1107_v44 = vstv %s1836_s26 }
  0x39   :  { %1528 = vmatmul.mubr.msk.f32.vlgmr.msra.gmra.mrb[0].mxu1 %vm76_vm0, %v61_v15  ;;  %1604 = vmatpush3.bf16.msra.mxu0 %v1601_v11  ;;  %v1629_v32 = vpack.c.bf16 %v846_v30, %v845_v29  ;;  %v1633_v35 = vpack.c.bf16 %v931_v34, %v930_v33  ;;  %v62_v36 = vld [vmem:[%s2209_s2] sm:$0xff]  ;;  %v63_v37 = vld [vmem:[%s2209_s2 + $0x8] sm:$0xff]  ;;  %2267 = sst [smem:[#allocation16_spill]] %s1830_s23  ;;  %s1840_s2 = sld [smem:[#allocation8 + $0x3]]  ;;  %v1204_v41 = vstv %s1830_s23  ;;  %v1200_v45 = vstv %s1838_s27 }
  0x3a   :  { %1608 = vmatpush3.bf16.msra.mxu1 %v1605_v16  ;;  %1534 = vmatprep.mubr.msk.f32.mxu0 %vm76_vm0, %v1782_v5  ;;  %2268 = sst [smem:[#allocation17_spill]] %s1832_s24  ;;  %s1858_s12 = sld [smem:[#allocation7 + $0x3]]  ;;  %v1297_v42 = vstv %s1832_s24  ;;  %v1027_v47 = vstv %s1842_s28 }
  0x3b   :  { %1541 = vmatprep.mubr.msk.f32.mxu1 %vm76_vm0, %v1782_v5  ;;  %1610 = vmatprep.subr.bf16.mxu0 %v1609_v19  ;;  %2269 = sst [smem:[#allocation18_spill]] %s1834_s25  ;;  %s1856_s11 = sld [smem:[#allocation7 + $0x182]]  ;;  %v1015_v39 = vstv %s1834_s25  ;;  %v1119_v48 = vstv %s1844_s29 }
  0x3c   :  { %1535 = vmatmul.mubr.msk.f32.vlgmr.msra.gmra.mrb[2].mxu0 %vm76_vm0, %v61_v15  ;;  %1614 = vmatprep.subr.bf16.mxu1 %v1613_v20  ;;  %2270 = sst [smem:[#allocation19_spill]] %s1836_s26  ;;  %s1860_s13 = sld [smem:[#allocation7 + $0x83]]  ;;  %v1212_v49 = vstv %s1846_s30  ;;  %v1035_v51 = vstv %s1850_s8 }
  0x3d   :  { %1542 = vmatmul.mubr.msk.f32.vlgmr.msra.gmra.mrb[2].mxu1 %vm76_vm0, %v61_v15  ;;  %1612 = vmatpush3.bf16.msra.mxu0 %v1609_v19  ;;  %2271 = sst [smem:[#allocation20_spill]] %s1838_s27  ;;  %s1862_s14 = sld [smem:[#allocation7 + $0x103]]  ;;  %v1305_v50 = vstv %s1848_s7  ;;  %v1127_v52 = vstv %s1852_s9 }
  0x3e   :  { %1616 = vmatpush3.bf16.msra.mxu1 %v1613_v20  ;;  %1548 = vmatprep.mubr.msk.f32.mxu0 %vm76_vm0, %v1782_v5  ;;  %2273 = sst [smem:[#allocation22_spill]] %s1842_s28  ;;  %s1864_s0 = sld [smem:[#allocation7 + $0x183]]  ;;  %v1220_v53 = vstv %s1854_s10 }
  0x3f   :  { %1555 = vmatprep.mubr.msk.f32.mxu1 %vm76_vm0, %v1782_v5  ;;  %1618 = vmatprep.subr.bf16.mxu0 %v1617_v25  ;;  %2272 = sst [smem:[#allocation21_spill]] %s1840_s2  ;;  %s1866_s4 = sld [smem:[#allocation7 + $0x4]]  ;;  %v1293_v46 = vstv %s1840_s2 }
  0x40   :  { %1549 = vmatmul.mubr.msk.f32.vlgmr.msra.gmra.mrb[4].mxu0 %vm76_vm0, %v61_v15  ;;  %1622 = vmatprep.subr.bf16.mxu1 %v1621_v26  ;;  %2274 = sst [smem:[#allocation23_spill]] %s1844_s29  ;;  %s1868_s15 = sld [smem:[#allocation7 + $0x84]]  ;;  %v1043_v55 = vstv %s1858_s12 }
  0x41   :  { %1556 = vmatmul.mubr.msk.f32.vlgmr.msra.gmra.mrb[4].mxu1 %vm76_vm0, %v61_v15  ;;  %1620 = vmatpush3.bf16.msra.mxu0 %v1617_v25  ;;  %2275 = sst [smem:[#allocation24_spill]] %s1846_s30  ;;  %s1870_s16 = sld [smem:[#allocation7 + $0x104]]  ;;  %v1313_v54 = vstv %s1856_s11 }
  0x42   :  { %1624 = vmatpush3.bf16.msra.mxu1 %v1621_v26  ;;  %1562 = vmatprep.mubr.msk.f32.mxu0 %vm76_vm0, %v1782_v5  ;;  %2276 = sst [smem:[#allocation25_spill]] %s1848_s7  ;;  %s1872_s17 = sld [smem:[#allocation7 + $0x184]]  ;;  %v1135_v56 = vstv %s1860_s13 }
  0x43   :  { %1569 = vmatprep.mubr.msk.f32.mxu1 %vm76_vm0, %v1782_v5  ;;  %1626 = vmatprep.subr.bf16.mxu0 %v1625_v31  ;;  %2277 = sst [smem:[#allocation26_spill]] %s1850_s8  ;;  %s1874_s1 = sld [smem:[#allocation7 + $0x5]]  ;;  %v1228_v57 = vstv %s1862_s14 }
  0x44   :  { %1563 = vmatmul.mubr.msk.f32.vlgmr.msra.gmra.mrb[6].mxu0 %vm76_vm0, %v61_v15  ;;  %1630 = vmatprep.subr.bf16.mxu1 %v1629_v32  ;;  %s1876_s18 = sld [smem:[#allocation7 + $0x85]]  ;;  %s1882_s3 = sld [smem:[#allocation7 + $0x6]]  ;;  %v1321_v58 = vstv %s1864_s0 }
  0x45   :  { %1570 = vmatmul.mubr.msk.f32.vlgmr.msra.gmra.mrb[6].mxu1 %vm76_vm0, %v61_v15  ;;  %1628 = vmatpush3.bf16.msra.mxu0 %v1625_v31  ;;  %s1878_s19 = sld [smem:[#allocation7 + $0x105]]  ;;  %s1884_s6 = sld [smem:[#allocation7 + $0x86]]  ;;  %v1051_v59 = vstv %s1866_s4 }
  0x46   :  { %1632 = vmatpush3.bf16.msra.mxu1 %v1629_v32  ;;  %1576 = vmatprep.mubr.msk.f32.mxu0 %vm76_vm0, %v1782_v5  ;;  %s1880_s20 = sld [smem:[#allocation7 + $0x185]]  ;;  %s1886_s5 = sld [smem:[#allocation7 + $0x106]]  ;;  %v1143_v60 = vstv %s1868_s15 }
  0x47   :  { %1583 = vmatprep.mubr.msk.f32.mxu1 %vm76_vm0, %v1782_v5  ;;  %1634 = vmatprep.subr.bf16.mxu0 %v1633_v35  ;;  %2278 = sst [smem:[#allocation27_spill]] %s1870_s16  ;;  %s1888_s16 = sld [smem:[#allocation7 + $0x186]] }
  0x48   :  { %1577 = vmatmul.mubr.msk.f32.vlgmr.msra.gmra.mrb[8].mxu0 %vm76_vm0, %v61_v15  ;;  %66 = vperm.xlu0 %1644, %v62_v36   ;;  %s1909_s25 = sld [smem:[#allocation7 + $0x8]]  ;;  %s2290_s23 = sld [smem:[#allocation27_spill]]  ;;  %v1329_v62 = vstv %s1872_s17 }
  0x49   :  { %1584 = vmatmul.mubr.msk.f32.vlgmr.msra.gmra.mrb[8].mxu1 %vm76_vm0, %v61_v15  ;;  %1636 = vmatpush3.bf16.msra.mxu0 %v1633_v35  ;;  %2279 = sst [smem:[#allocation28_spill]] %s1874_s1  ;;  %s1891_s1 = sld [smem:[#allocation7 + $0x7]] }
  0x4a   :  { %1590 = vmatprep.mubr.msk.f32.mxu0 %vm76_vm0, %v1782_v5  ;;  %s1911_s24 = sld [smem:[#allocation7 + $0x88]]  ;;  %s2292_s27 = sld [smem:[#allocation28_spill]]  ;;  %v1151_v0 = vstv %s1876_s18  ;;  %v1067_v3 = vstv %s1882_s3 }
  0x4b   :  { %2280 = sst [smem:[#allocation29_spill]] %s1878_s19  ;;  %s1893_s19 = sld [smem:[#allocation7 + $0x87]] }
  0x4c   :  { %1591 = vmatmul.mubr.msk.f32.vlgmr.msra.gmra.mrb[10].mxu0 %vm76_vm0, %v61_v15  ;;  %71 = vperm.xlu0 %1644, %v63_v37   ;;  %2281 = sst [smem:[#allocation30_spill]] %s1884_s6  ;;  %s1917_s22 = sld [smem:[#allocation7 + $0x108]]  ;;  %v1337_v2 = vstv %s1880_s20 }
  0x4d   :  { %2282 = sst [smem:[#allocation31_spill]] %s1886_s5  ;;  %s1899_s6 = sld [smem:[#allocation7 + $0x107]] }
  0x4e   :  { %2283 = sst [smem:[#allocation32_spill]] %s1888_s16  ;;  %s1901_s5 = sld [smem:[#allocation7 + $0x187]]  ;;  %v1236_v61 = vstv %s2290_s23 }
  0x4f   :  { %2284 = sst [smem:[#allocation33_spill]] %s1891_s1  ;;  %s1919_s2 = sld [smem:[#allocation7 + $0x188]] }
  0x50   :  { %2288 = sst [smem:[#allocation37_spill]] %s1909_s25  ;;  %s1925_s29 = sld [smem:[#allocation7 + $0x9]]  ;;  %v1059_v63 = vstv %s2292_s27 }
  0x51   :  { %2285 = sst [smem:[#allocation34_spill]] %s1893_s19  ;;  %s2294_s26 = sld [smem:[#allocation29_spill]] }
  0x52   :  { %2289 = sst [smem:[#allocation38_spill]] %s1911_s24  ;;  %s1927_s30 = sld [smem:[#allocation7 + $0x89]] }
  0x53   :  { %2286 = sst [smem:[#allocation35_spill]] %s1899_s6  ;;  %s2296_s7 = sld [smem:[#allocation30_spill]] }
  0x54   :  { %2287 = sst [smem:[#allocation36_spill]] %s1901_s5  ;;  %s2297_s8 = sld [smem:[#allocation31_spill]] }
  0x55   :  { %2291 = sst [smem:[#allocation27_spill]] %s1917_s22  ;;  %s1933_s28 = sld [smem:[#allocation7 + $0x109]] }
  0x56   :  { %2293 = sst [smem:[#allocation28_spill]] %s1919_s2  ;;  %s2311_s21 = sld [smem:[#allocation32_spill]] }
  0x57   :  { %2295 = sst [smem:[#allocation29_spill]] %s1925_s29  ;;  %v1244_v1 = vstv %s2294_s26  ;;  %s2312_s22 = sld [smem:[#allocation33_spill]] }
  0x58   :  { %s2313_s23 = sld [smem:[#allocation34_spill]]  ;;  %s2314_s24 = sld [smem:[#allocation35_spill]] }
  0x59   :  { %v1159_v6 = vstv %s2296_s7  ;;  %s2315_s25 = sld [smem:[#allocation36_spill]]  ;;  %s2111_s27 = sld [smem:[#allocation7 + $0x189]] }
  0x5a   :  { %v1252_v7 = vstv %s2297_s8  ;;  %s2324_s3 = sld [smem:[#allocation37_spill]]  ;;  %s2326_s26 = sld [smem:[#allocation38_spill]] }
  0x5b   :  { %s2328_s2 = sld [smem:[#allocation27_spill]]  ;;  %s2329_s29 = sld [smem:[#allocation28_spill]] }
  0x5c   :  { %s2152_s7 = sld [smem:[#allocation7 + $0xa]]  ;;  %s2330_s8 = sld [smem:[#allocation29_spill]] }
  0x5d   :  { %s2154_s9 = sld [smem:[#allocation7 + $0x8a]]  ;;  %s1727_s12 = smov [#allocation10]  }
  0x5e   :  { %s2156_s10 = sld [smem:[#allocation7 + $0x10a]]  ;;  %s1390_s13 = sshll.u32 %s1727_s12, 4  ;;  %s1391_s13 = int_to_ptr.vmem [resolvable:$true] %s1390_s13 }
  0x5f   :  { %s2158_s11 = sld [smem:[#allocation7 + $0x18a]]  ;;  %p1696_p5 = scmp.lt.s32.totalorder %s1391_s13, %s1391_s13 }
  0xc7   :  { %v1903_v43 = vpop.permute.xlu0 %66 }
  0xcb   :  { %v1943_v4 = vpop.permute.xlu0 %71 }
 0x10b   :  { %v1522_v5 = vpop.f32.mrb[0].mxu0 }
 0x10c   :  { %v155_v10 = vadd.f32 %v1522_v5, %v1943_v4  ;;  %v1529_v11 = vpop.f32.mrb[0].mxu1  ;;  %v149_v12 = vpop.f32.mrb[1].mxu0 }
 0x10d   :  { %v239_v16 = vadd.f32 %v1529_v11, %v1943_v4  ;;  %v150_v17 = vadd.f32 %v149_v12, %v1903_v43  ;;  %v233_v18 = vpop.f32.mrb[1].mxu1 }
 0x10e   :  { %v159_v21 = vmax.f32 %v155_v10, 0.0  ;;  %v234_v22 = vadd.f32 %v233_v18, %v1903_v43 }
 0x10f   :  { %v243_v25 = vmax.f32 %v239_v16, 0.0  ;;  %v158_v26 = vmax.f32 %v150_v17, 0.0  ;;  %v1536_v27 = vpop.f32.mrb[2].mxu0 }
 0x110   :  { %v161_v30 = vmin.f32 %v159_v21, 4.0  ;;  %v242_v31 = vmax.f32 %v234_v22, 0.0  ;;  %v324_v32 = vadd.f32 %v1536_v27, %v1943_v4  ;;  %v1543_v33 = vpop.f32.mrb[2].mxu1  ;;  %v318_v34 = vpop.f32.mrb[3].mxu0 }
 0x111   :  { %v245_v36 = vmin.f32 %v243_v25, 4.0  ;;  %v160_v37 = vmin.f32 %v158_v26, 4.0  ;;  %v409_v5 = vadd.f32 %v1543_v33, %v1943_v4  ;;  %v319_v10 = vadd.f32 %v318_v34, %v1903_v43  ;;  %v403_v11 = vpop.f32.mrb[3].mxu1 }
 0x112   :  { %v1021_v12 = vmul.f32 %v1019_v38, %v161_v30  ;;  %v1113_v16 = vmul.f32 %v1111_v40, %v161_v30  ;;  %v1206_v17 = vmul.f32 %v1204_v41, %v161_v30  ;;  %v1299_v18 = vmul.f32 %v1297_v42, %v161_v30 }
 0x113   :  { %v1029_v21 = vmul.f32 %v1027_v47, %v245_v36  ;;  %v1121_v22 = vmul.f32 %v1119_v48, %v245_v36  ;;  %v1214_v25 = vmul.f32 %v1212_v49, %v245_v36  ;;  %v1307_v26 = vmul.f32 %v1305_v50, %v245_v36  ;;  %v1550_v27 = vpop.f32.mrb[4].mxu0 }
 0x114   :  { %v1023_v33 = vadd.f32 %v1021_v12, %v1015_v39  ;;  %v1115_v34 = vadd.f32 %v1113_v16, %v1107_v44  ;;  %v1208_v35 = vadd.f32 %v1206_v17, %v1200_v45  ;;  %v1301_v30 = vadd.f32 %v1299_v18, %v1293_v46  ;;  %v1557_v29 = vpop.f32.mrb[4].mxu1  ;;  %v488_v28 = vpop.f32.mrb[5].mxu0 }
 0x115   :  { %v1020_v24 = vmul.f32 %v1019_v38, %v160_v37  ;;  %v1112_v23 = vmul.f32 %v1111_v40, %v160_v37  ;;  %v1205_v36 = vmul.f32 %v1204_v41, %v160_v37  ;;  %v1298_v20 = vmul.f32 %v1297_v42, %v160_v37  ;;  %v1998_v12 = vpop.f32.mrb[5].mxu1 }
 0x116   :  { %v1031_v19 = vadd.f32 %v1029_v21, %v1023_v33  ;;  %v1123_v16 = vadd.f32 %v1121_v22, %v1115_v34  ;;  %v1216_v15 = vadd.f32 %v1214_v25, %v1208_v35  ;;  %v1309_v14 = vadd.f32 %v1307_v26, %v1301_v30 }
 0x117   :  { %v1022_v17 = vadd.f32 %v1020_v24, %v1015_v39  ;;  %v1114_v18 = vadd.f32 %v1112_v23, %v1107_v44  ;;  %v1207_v38 = vadd.f32 %v1205_v36, %v1200_v45  ;;  %v1300_v40 = vadd.f32 %v1298_v20, %v1293_v46  ;;  %v1564_v41 = vpop.f32.mrb[6].mxu0 }
 0x118   :  { %v244_v42 = vmin.f32 %v242_v31, 4.0  ;;  %v328_v37 = vmax.f32 %v324_v32, 0.0  ;;  %v413_v13 = vmax.f32 %v409_v5, 0.0  ;;  %v327_v21 = vmax.f32 %v319_v10, 0.0  ;;  %v1571_v22 = vpop.f32.mrb[6].mxu1  ;;  %v658_v35 = vpop.f32.mrb[7].mxu0 }
 0x119   :  { %v404_v25 = vadd.f32 %v403_v11, %v1903_v43  ;;  %v494_v39 = vadd.f32 %v1550_v27, %v1943_v4  ;;  %v579_v44 = vadd.f32 %v1557_v29, %v1943_v4  ;;  %v489_v23 = vadd.f32 %v488_v28, %v1903_v43  ;;  %v2012_v45 = vpop.f32.mrb[7].mxu1 }
 0x11a   :  { %v1028_v46 = vmul.f32 %v1027_v47, %v244_v42  ;;  %v1120_v20 = vmul.f32 %v1119_v48, %v244_v42  ;;  %v1213_v24 = vmul.f32 %v1212_v49, %v244_v42  ;;  %v1306_v31 = vmul.f32 %v1305_v50, %v244_v42 }
 0x11b   :  { %v330_v32 = vmin.f32 %v328_v37, 4.0  ;;  %v415_v5 = vmin.f32 %v413_v13, 4.0  ;;  %v329_v29 = vmin.f32 %v327_v21, 4.0  ;;  %v412_v28 = vmax.f32 %v404_v25, 0.0  ;;  %v2022_v10 = vpop.f32.mrb[8].mxu0 }
 0x11c   :  { %v1030_v47 = vadd.f32 %v1028_v46, %v1022_v17  ;;  %v1122_v11 = vadd.f32 %v1120_v20, %v1114_v18  ;;  %v1215_v26 = vadd.f32 %v1213_v24, %v1207_v38  ;;  %v1308_v48 = vadd.f32 %v1306_v31, %v1300_v40  ;;  %v2024_v27 = vpop.f32.mrb[8].mxu1  ;;  %v2026_v49 = vpop.f32.mrb[9].mxu0 }
 0x11d   :  { %v1037_v50 = vmul.f32 %v1035_v51, %v330_v32  ;;  %v1129_v13 = vmul.f32 %v1127_v52, %v330_v32  ;;  %v1222_v33 = vmul.f32 %v1220_v53, %v330_v32  ;;  %v1315_v34 = vmul.f32 %v1313_v54, %v330_v32  ;;  %v2036_v30 = vpop.f32.mrb[9].mxu1 }
 0x11e   :  { %v1045_v36 = vmul.f32 %v1043_v55, %v415_v5  ;;  %v1137_v17 = vmul.f32 %v1135_v56, %v415_v5  ;;  %v1230_v18 = vmul.f32 %v1228_v57, %v415_v5  ;;  %v1323_v38 = vmul.f32 %v1321_v58, %v415_v5 }
 0x11f   :  { %v1039_v40 = vadd.f32 %v1037_v50, %v1031_v19  ;;  %v1131_v42 = vadd.f32 %v1129_v13, %v1123_v16  ;;  %v1224_v37 = vadd.f32 %v1222_v33, %v1216_v15  ;;  %v1317_v21 = vadd.f32 %v1315_v34, %v1309_v14  ;;  %v2046_v25 = vpop.f32.mrb[10].mxu0 }
 0x120   :  { %v1036_v46 = vmul.f32 %v1035_v51, %v329_v29  ;;  %v1128_v20 = vmul.f32 %v1127_v52, %v329_v29  ;;  %v1221_v24 = vmul.f32 %v1220_v53, %v329_v29  ;;  %v1314_v31 = vmul.f32 %v1313_v54, %v329_v29  ;;  %v2056_v32 = vpop.f32.mrb[11].mxu0 }
 0x121   :  { %v1047_v9 = vadd.f32 %v1045_v36, %v1039_v40  ;;  %v1139_v8 = vadd.f32 %v1137_v17, %v1131_v42  ;;  %v1232_v19 = vadd.f32 %v1230_v18, %v1224_v37  ;;  %v1325_v15 = vadd.f32 %v1323_v38, %v1317_v21 }
 0x122   :  { %v1038_v14 = vadd.f32 %v1036_v46, %v1030_v47  ;;  %v1130_v16 = vadd.f32 %v1128_v20, %v1122_v11  ;;  %v1223_v5 = vadd.f32 %v1221_v24, %v1215_v26  ;;  %v1316_v51 = vadd.f32 %v1314_v31, %v1308_v48 }
 0x123   :  { %v414_v50 = vmin.f32 %v412_v28, 4.0  ;;  %v498_v52 = vmax.f32 %v494_v39, 0.0  ;;  %v583_v13 = vmax.f32 %v579_v44, 0.0  ;;  %v497_v53 = vmax.f32 %v489_v23, 0.0 }
 0x124   :  { %v574_v54 = vadd.f32 %v1998_v12, %v1903_v43  ;;  %v664_v29 = vadd.f32 %v1564_v41, %v1943_v4  ;;  %v749_v33 = vadd.f32 %v1571_v22, %v1943_v4  ;;  %v659_v34 = vadd.f32 %v658_v35, %v1903_v43 }
 0x125   :  { %v1044_v47 = vmul.f32 %v1043_v55, %v414_v50  ;;  %v1136_v39 = vmul.f32 %v1135_v56, %v414_v50  ;;  %v1229_v44 = vmul.f32 %v1228_v57, %v414_v50  ;;  %v1322_v12 = vmul.f32 %v1321_v58, %v414_v50 }
 0x126   :  { %v500_v41 = vmin.f32 %v498_v52, 4.0  ;;  %v585_v23 = vmin.f32 %v583_v13, 4.0  ;;  %v499_v28 = vmin.f32 %v497_v53, 4.0  ;;  %v582_v22 = vmax.f32 %v574_v54, 0.0 }
 0x127   :  { %v1046_v11 = vadd.f32 %v1044_v47, %v1038_v14  ;;  %v1138_v35 = vadd.f32 %v1136_v39, %v1130_v16  ;;  %v1231_v26 = vadd.f32 %v1229_v44, %v1223_v5  ;;  %v1324_v55 = vadd.f32 %v1322_v12, %v1316_v51 }
 0x128   :  { %v1053_v56 = vmul.f32 %v1051_v59, %v500_v41  ;;  %v1145_v57 = vmul.f32 %v1143_v60, %v500_v41  ;;  %v1238_v48 = vmul.f32 %v1236_v61, %v500_v41  ;;  %v1331_v58 = vmul.f32 %v1329_v62, %v500_v41 }
 0x129   :  { %v1061_v36 = vmul.f32 %v1059_v63, %v585_v23  ;;  %v1153_v17 = vmul.f32 %v1151_v0, %v585_v23  ;;  %v1246_v18 = vmul.f32 %v1244_v1, %v585_v23  ;;  %v1339_v38 = vmul.f32 %v1337_v2, %v585_v23 }
 0x12a   :  { %v1055_v40 = vadd.f32 %v1053_v56, %v1047_v9  ;;  %v1147_v42 = vadd.f32 %v1145_v57, %v1139_v8  ;;  %v1240_v37 = vadd.f32 %v1238_v48, %v1232_v19  ;;  %v1333_v21 = vadd.f32 %v1331_v58, %v1325_v15 }
 0x12b   :  { %v1052_v46 = vmul.f32 %v1051_v59, %v499_v28  ;;  %v1144_v20 = vmul.f32 %v1143_v60, %v499_v28  ;;  %v1237_v24 = vmul.f32 %v1236_v61, %v499_v28  ;;  %v1330_v31 = vmul.f32 %v1329_v62, %v499_v28 }
 0x12c   :  { %v1063_v14 = vadd.f32 %v1061_v36, %v1055_v40  ;;  %v1155_v16 = vadd.f32 %v1153_v17, %v1147_v42  ;;  %v1248_v5 = vadd.f32 %v1246_v18, %v1240_v37  ;;  %v1341_v51 = vadd.f32 %v1339_v38, %v1333_v21 }
 0x12d   :  { %v1054_v9 = vadd.f32 %v1052_v46, %v1046_v11  ;;  %v1146_v8 = vadd.f32 %v1144_v20, %v1138_v35  ;;  %v1239_v19 = vadd.f32 %v1237_v24, %v1231_v26  ;;  %v1332_v15 = vadd.f32 %v1330_v31, %v1324_v55 }
 0x12e   :  { %v584_v50 = vmin.f32 %v582_v22, 4.0  ;;  %v668_v59 = vmax.f32 %v664_v29, 0.0  ;;  %v753_v52 = vmax.f32 %v749_v33, 0.0  ;;  %v667_v60 = vmax.f32 %v659_v34, 0.0 }
 0x12f   :  { %v744_v61 = vadd.f32 %v2012_v45, %v1903_v43  ;;  %v834_v62 = vadd.f32 %v2022_v10, %v1943_v4  ;;  %v919_v13 = vadd.f32 %v2024_v27, %v1943_v4  ;;  %v829_v53 = vadd.f32 %v2026_v49, %v1903_v43 }
 0x130   :  { %v1060_v54 = vmul.f32 %v1059_v63, %v584_v50  ;;  %v1152_v29 = vmul.f32 %v1151_v0, %v584_v50  ;;  %v1245_v45 = vmul.f32 %v1244_v1, %v584_v50  ;;  %v1338_v10 = vmul.f32 %v1337_v2, %v584_v50 }
 0x131   :  { %v670_v33 = vmin.f32 %v668_v59, 4.0  ;;  %v755_v27 = vmin.f32 %v753_v52, 4.0  ;;  %v669_v34 = vmin.f32 %v667_v60, 4.0  ;;  %v752_v47 = vmax.f32 %v744_v61, 0.0 }
 0x132   :  { %v1062_v39 = vadd.f32 %v1060_v54, %v1054_v9  ;;  %v1154_v49 = vadd.f32 %v1152_v29, %v1146_v8  ;;  %v1247_v44 = vadd.f32 %v1245_v45, %v1239_v19  ;;  %v1340_v63 = vadd.f32 %v1338_v10, %v1332_v15 }
 0x133   :  { %v1069_v0 = vmul.f32 %v1067_v3, %v670_v33  ;;  %v1161_v1 = vmul.f32 %v1159_v6, %v670_v33  ;;  %v1254_v2 = vmul.f32 %v1252_v7, %v670_v33  ;;  %v2316_v12 = vstv %s2311_s21 }
 0x134   :  { %v1347_v41 = vmul.f32 %v2316_v12, %v670_v33  ;;  %v2317_v23 = vstv %s2312_s22  ;;  %v2318_v22 = vstv %s2313_s23  ;;  %v2319_v35 = vstv %s2314_s24 }
 0x135   :  { %v1077_v28 = vmul.f32 %v2317_v23, %v755_v27  ;;  %v1169_v11 = vmul.f32 %v2318_v22, %v755_v27  ;;  %v1262_v26 = vmul.f32 %v2319_v35, %v755_v27  ;;  %v2320_v55 = vstv %s2315_s25 }
 0x136   :  { %v1355_v56 = vmul.f32 %v2320_v55, %v755_v27  ;;  %v1071_v57 = vadd.f32 %v1069_v0, %v1063_v14  ;;  %v1163_v48 = vadd.f32 %v1161_v1, %v1155_v16  ;;  %v1256_v58 = vadd.f32 %v1254_v2, %v1248_v5 }
 0x137   :  { %v1349_v36 = vadd.f32 %v1347_v41, %v1341_v51  ;;  %v1068_v17 = vmul.f32 %v1067_v3, %v669_v34  ;;  %v1160_v18 = vmul.f32 %v1159_v6, %v669_v34  ;;  %v1253_v38 = vmul.f32 %v1252_v7, %v669_v34 }
 0x138   :  { %v2321_v40 = vmov %v2316_v12  ;;  %v1079_v37 = vadd.f32 %v1077_v28, %v1071_v57  ;;  %v1171_v21 = vadd.f32 %v1169_v11, %v1163_v48  ;;  %v1264_v46 = vadd.f32 %v1262_v26, %v1256_v58 }
 0x139   :  { %v1346_v42 = vmul.f32 %v2321_v40, %v669_v34  ;;  %v1357_v20 = vadd.f32 %v1355_v56, %v1349_v36  ;;  %v1070_v24 = vadd.f32 %v1068_v17, %v1062_v39  ;;  %v1162_v31 = vadd.f32 %v1160_v18, %v1154_v49 }
 0x13a   :  { %v1255_v14 = vadd.f32 %v1253_v38, %v1247_v44  ;;  %v754_v3 = vmin.f32 %v752_v47, 4.0  ;;  %v838_v5 = vmax.f32 %v834_v62, 0.0  ;;  %v923_v51 = vmax.f32 %v919_v13, 0.0 }
 0x13b   :  { %v1348_v16 = vadd.f32 %v1346_v42, %v1340_v63  ;;  %v837_v6 = vmax.f32 %v829_v53, 0.0  ;;  %v1369_v9 = vstv %s2111_s27  ;;  %v914_v7 = vadd.f32 %v2036_v30, %v1903_v43 }
 0x13c   :  { %v1004_v8 = vadd.f32 %v2046_v25, %v1943_v4  ;;  %v999_v19 = vadd.f32 %v2056_v32, %v1903_v43  ;;  %v2322_v15 = vmov %v2317_v23  ;;  %v2323_v59 = vmov %v2318_v22 }
 0x13d   :  { %v1076_v50 = vmul.f32 %v2322_v15, %v754_v3  ;;  %v1168_v52 = vmul.f32 %v2323_v59, %v754_v3  ;;  %v2325_v60 = vmov %v2319_v35  ;;  %v2327_v62 = vmov %v2320_v55 }
 0x13e   :  { %v1261_v61 = vmul.f32 %v2325_v60, %v754_v3  ;;  %v1354_v13 = vmul.f32 %v2327_v62, %v754_v3  ;;  %v840_v30 = vmin.f32 %v838_v5, 4.0  ;;  %v925_v4 = vmin.f32 %v923_v51, 4.0 }
 0x13f   :  { %v839_v43 = vmin.f32 %v837_v6, 4.0  ;;  %v922_v25 = vmax.f32 %v914_v7, 0.0  ;;  %v1078_v32 = vadd.f32 %v1076_v50, %v1070_v24  ;;  %v1170_v53 = vadd.f32 %v1168_v52, %v1162_v31 }
 0x140   :  { %v1263_v54 = vadd.f32 %v1261_v61, %v1255_v14  ;;  %v1356_v29 = vadd.f32 %v1354_v13, %v1348_v16  ;;  %v2331_v45 = vstv %s2324_s3  ;;  %v2332_v33 = vstv %s2326_s26 }
 0x141   :  { %v1085_v10 = vmul.f32 %v2331_v45, %v840_v30  ;;  %v1177_v27 = vmul.f32 %v2332_v33, %v840_v30  ;;  %v2333_v34 = vstv %s2328_s2  ;;  %v2334_v39 = vstv %s2329_s29 }
 0x142   :  { %v1270_v47 = vmul.f32 %v2333_v34, %v840_v30  ;;  %v1363_v49 = vmul.f32 %v2334_v39, %v840_v30  ;;  %v2335_v44 = vstv %s2330_s8  ;;  %v2336_v0 = vstv %s1927_s30 }
 0x143   :  { %v1093_v63 = vmul.f32 %v2335_v44, %v925_v4  ;;  %v1185_v1 = vmul.f32 %v2336_v0, %v925_v4  ;;  %v2337_v2 = vstv %s1933_s28  ;;  %v1371_v41 = vmul.f32 %v1369_v9, %v925_v4  ;;  %s1691_s28 = scalar_lea.vmem %s1391_s13, 1024 }
 0x144   :  { %v1278_v12 = vmul.f32 %v2337_v2, %v925_v4  ;;  %v1087_v23 = vadd.f32 %v1085_v10, %v1079_v37  ;;  %v1179_v28 = vadd.f32 %v1177_v27, %v1171_v21  ;;  %v1272_v22 = vadd.f32 %v1270_v47, %v1264_v46  ;;  %p1692_p4 = scmp.ne.s32.totalorder %s1391_s13, %s1691_s28  ;;  %p1697_p6 = scmp.lt.s32.totalorder %s1691_s28, %s1691_s28 }
 0x145   :  { %v1365_v11 = vadd.f32 %v1363_v49, %v1357_v20  ;;  %v2338_v35 = vmov %v2331_v45  ;;  %v2339_v55 = vmov %v2332_v33  ;;  %v2340_v57 = vmov %v2333_v34 }
 0x146   :  { %v1084_v26 = vmul.f32 %v2338_v35, %v839_v43  ;;  %v1176_v56 = vmul.f32 %v2339_v55, %v839_v43  ;;  %v1269_v48 = vmul.f32 %v2340_v57, %v839_v43  ;;  %v2341_v58 = vmov %v2334_v39  ;;  %p1698_p7 = por %p1697_p6, %p1696_p5 }
 0x147   :  { %v1362_v36 = vmul.f32 %v2341_v58, %v839_v43  ;;  %v1095_v17 = vadd.f32 %v1093_v63, %v1087_v23  ;;  %v1187_v18 = vadd.f32 %v1185_v1, %v1179_v28  ;;  %v1280_v38 = vadd.f32 %v1278_v12, %v1272_v22 }
 0x148   :  { %v1373_v40 = vadd.f32 %v1371_v41, %v1365_v11  ;;  %v1086_v42 = vadd.f32 %v1084_v26, %v1078_v32  ;;  %v1178_v37 = vadd.f32 %v1176_v56, %v1170_v53  ;;  %v1271_v21 = vadd.f32 %v1269_v48, %v1263_v54  ;;  %p1699_p8 = pnand %p1698_p7, %p1692_p4 }
 0x149   :  { %v1364_v46 = vadd.f32 %v1362_v36, %v1356_v29  ;;  %v924_v20 = vmin.f32 %v922_v25, 4.0  ;;  %v1008_v24 = vmax.f32 %v1004_v8, 0.0  ;;  %v1007_v31 = vmax.f32 %v999_v19, 0.0 }
 0x14a   :  { %v1099_v14 = vstv %s2152_s7  ;;  %v1191_v16 = vstv %s2154_s9  ;;  %v1284_v3 = vstv %s2156_s10  ;;  %v1377_v5 = vstv %s2158_s11 }
 0x14b   :  { %v2342_v51 = vmov %v2335_v44  ;;  %v2343_v7 = vmov %v2336_v0  ;;  %v2344_v50 = vmov %v2337_v2  ;;  %v1370_v52 = vmul.f32 %v1369_v9, %v924_v20 }
 0x14c   :  { %v1092_v6 = vmul.f32 %v2342_v51, %v924_v20  ;;  %v1184_v15 = vmul.f32 %v2343_v7, %v924_v20  ;;  %v1277_v59 = vmul.f32 %v2344_v50, %v924_v20  ;;  %v1010_v60 = vmin.f32 %v1008_v24, 4.0 }
 0x14d   :  { %v1009_v61 = vmin.f32 %v1007_v31, 4.0  ;;  %v1372_v4 = vadd.f32 %v1370_v52, %v1364_v46 }
 0x14e   :  { %v1094_v62 = vadd.f32 %v1092_v6, %v1086_v42  ;;  %v1186_v13 = vadd.f32 %v1184_v15, %v1178_v37  ;;  %v1279_v30 = vadd.f32 %v1277_v59, %v1271_v21  ;;  %v1101_v43 = vmul.f32 %v1099_v14, %v1010_v60 }
 0x14f   :  { %v1193_v8 = vmul.f32 %v1191_v16, %v1010_v60  ;;  %v1286_v19 = vmul.f32 %v1284_v3, %v1010_v60  ;;  %v1379_v25 = vmul.f32 %v1377_v5, %v1010_v60  ;;  %v1100_v32 = vmul.f32 %v1099_v14, %v1009_v61 }
 0x150   :  { %v1192_v53 = vmul.f32 %v1191_v16, %v1009_v61  ;;  %v1285_v54 = vmul.f32 %v1284_v3, %v1009_v61  ;;  %v1378_v29 = vmul.f32 %v1377_v5, %v1009_v61  ;;  %v1103_v45 = vadd.f32 %v1101_v43, %v1095_v17 }
 0x151   :  { %v1195_v10 = vadd.f32 %v1193_v8, %v1187_v18  ;;  %v1288_v33 = vadd.f32 %v1286_v19, %v1280_v38  ;;  %v1381_v9 = vadd.f32 %v1379_v25, %v1373_v40  ;;  %v1102_v27 = vadd.f32 %v1100_v32, %v1094_v62 }
 0x152   :  { %v1194_v34 = vadd.f32 %v1192_v53, %v1186_v13  ;;  %v1287_v47 = vadd.f32 %v1285_v54, %v1279_v30  ;;  %v1380_v39 = vadd.f32 %v1378_v29, %v1372_v4  ;;  %1105 = vst [vmem:[#allocation10 + $0x8] sm:$0xff] %v1103_v45 }
 0x153   :  { %1198 = vst [vmem:[#allocation10 + $0x18] sm:$0xff] %v1195_v10  ;;  %1291 = vst [vmem:[#allocation10 + $0x28] sm:$0xff] %v1288_v33 }
 0x154   :  { %1384 = vst [vmem:[#allocation10 + $0x38] sm:$0xff] %v1381_v9  ;;  %1104 = vst [vmem:[#allocation10] sm:$0xff] %v1102_v27 }
 0x155   :  { %1197 = vst [vmem:[#allocation10 + $0x10] sm:$0xff] %v1194_v34  ;;  %1290 = vst [vmem:[#allocation10 + $0x20] sm:$0xff] %v1287_v47 }
 0x156   :  { %1383 = vst [vmem:[#allocation10 + $0x30] sm:$0xff] %v1380_v39 }
 0x157   :  { %1702 = shalt.err (!%p1699_p8)
}
 0x158   :  { %s2345_s0 = sld [smem:[#allocation39_spill]] }
 0x15e   :  { %s1703_s4 = scalar_lea.hbm %s2345_s0, 1024 }
 0x15f   :  { %p1704_p9 = scmp.ne.s32.totalorder %s2345_s0, %s1703_s4  ;;  %p1707_p10 = scmp.lt.u32.totalorder %s1703_s4, %s2345_s0 }
 0x161   :  { %p1709_p11 = pnand %p1707_p10, %p1704_p9 }
 0x163   :  { %1712 = shalt.err (!%p1709_p11)
}
 0x164   :  { %s2346_s18 = smov 8   ;;  %s2347_s19 = smov 128  }
 0x165   :  { %1396 = dma.vmem_to_hbm [thread:$0]  %s1391_s13, 1024, %s2345_s0, [#allocation5], %s2347_s19, %s2347_s19, %s2346_s18  }
 0x166   :  { %1719 = dma.done.wait [#allocation5], 1024  }
 0x167   :  { %1720 = vsyncadd [#allocation5], 4294966272 }
 0x168   :  { %1400 = vsyncpa [#allocation4], 1 }
 0x169   :  { %1401 = vsyncpa [#allocation5], 1 }
 0x16a   :  { %1402 = vsyncpa [#allocation6], 1 }
 0x16b   :  { %1403 = vsyncpa [#allocation9], 1 }

</bundles_post_ra>
